<compile_context>
chip_gen: v7x
topology: tpu7x:2x2x1
jax: 0.10.0
libtpu: 0.0.40
codegen_flags: <defaults>
</compile_context>

<pallas_src>
import functools

import jax
import jax.numpy as jnp
from jax import lax
from jax.experimental import pallas as pl
from jax.experimental.pallas import tpu as pltpu


# ---------------------------------------------------------------------------
# Fused kernel: block-diag q/k/v projection + per-head attention + fc_out
# ---------------------------------------------------------------------------
def _mha_kernel(q_ref, k_ref, v_ref, w_ref, b_ref, o_ref, *, heads, head_dim, nb):
    """One grid step processes `nb` batch elements, all heads + fc_out fused.

    q_ref/k_ref/v_ref: (nb, L, E)  activations (f32)
    w_ref:             (4, E, E)   [wq_bd (scale folded), wk_bd, wv_bd, wfc_t]
                                   in the compute dtype (bf16 by default)
    b_ref:             (1, E)      fc_out bias (f32, added post-accumulation)
    o_ref:             (nb, Q, E)  output (f32)
    """
    cdt = w_ref.dtype                     # MXU operand dtype (bf16 or f32)
    E = heads * head_dim
    Q = q_ref.shape[1]
    K = k_ref.shape[1]

    # Fold the batch into the sublane axis: one E-wide MXU contraction per
    # tensor with an (nb*L)-sublane LHS (better MXU fill, 1 matmul instead of
    # nb).  The 1/sqrt(head_dim) softmax scale is already folded into w_ref[0].
    # NOTE: the block-diagonal weight wastes 7/8 of the projection FLOPs on
    # zeros -- negligible at E=256/L=8, revisit if E or L grows.
    q2 = q_ref[...].reshape(nb * Q, E).astype(cdt)
    k2 = k_ref[...].reshape(nb * K, E).astype(cdt)
    v2 = v_ref[...].reshape(nb * K, E).astype(cdt)

    qp = jnp.dot(q2, w_ref[0], preferred_element_type=jnp.float32)   # (nb*Q, E)
    kp = jnp.dot(k2, w_ref[1], preferred_element_type=jnp.float32)   # (nb*K, E)
    vp = jnp.dot(v2, w_ref[2], preferred_element_type=jnp.float32)   # (nb*K, E)

    wfc = w_ref[3]                                                    # (E, E) cdt
    bias = b_ref[...].astype(jnp.float32)                             # (1, E)

    # Per (batch, head) attention, statically unrolled (nb*heads is small).
    for b in range(nb):
        acc = jnp.zeros((Q, E), jnp.float32)
        for h in range(heads):
            lo = h * head_dim
            hi = lo + head_dim
            qh = qp[b * Q:(b + 1) * Q, lo:hi]                         # (Q, D)
            kh = kp[b * K:(b + 1) * K, lo:hi]                         # (K, D)
            vh = vp[b * K:(b + 1) * K, lo:hi]                         # (K, D)

            # scores = qh @ kh^T without materializing a transpose.
            s = lax.dot_general(qh, kh,
                                dimension_numbers=(((1,), (1,)), ((), ())),
                                preferred_element_type=jnp.float32)   # (Q, K)

            # Numerically stable softmax over the key axis (dim=3 in torch).
            # Exact divide: EUP/VPU is not the bottleneck -> effectively free.
            m = jnp.max(s, axis=-1, keepdims=True)
            p = jnp.exp(s - m)
            attn = p / jnp.sum(p, axis=-1, keepdims=True)

            ctx = jnp.dot(attn.astype(cdt), vh.astype(cdt),
                          preferred_element_type=jnp.float32)         # (Q, D)

            # fc_out fused as an accumulation over sublane-aligned head slices
            # of the fc weight -- drops the lane-concat of head contexts.
            acc = acc + jnp.dot(ctx.astype(cdt), wfc[lo:hi, :],
                                preferred_element_type=jnp.float32)   # (Q, E)

        # Lane-dense (Q, E=256) store -> unmasked vst.
        o_ref[b] = (acc + bias).astype(o_ref.dtype)


# ---------------------------------------------------------------------------
# pallas_call wrapper
# ---------------------------------------------------------------------------
def _auto_batch_per_step(n_batch):
    """v5e/v6e have one TensorCore: collapse the grid to a single step (no
    per-step launch/pipeline overhead).  v7x has 2 TCs/chip: keep the batch on
    a parallel grid axis so both cores get work."""
    try:
        kind = jax.devices()[0].device_kind.lower()
        if "7" in kind:            # TPU v7x
            return 1
    except Exception:
        pass
    return n_batch


def mha_forward(queries, keys, values, w_stack, b, *, heads, head_dim,
                batch_per_step=None):
    """queries/keys/values: (N, L, E); w_stack: (4, E, E); b: (1, E)."""
    N, Ql, E = queries.shape
    Kl = keys.shape[1]
    Vl = values.shape[1]
    assert Kl == Vl, "key/value sequence lengths must match"

    nb = batch_per_step or _auto_batch_per_step(N)
    if N % nb != 0:
        nb = 1
    grid = (N // nb,)

    def act_spec(L):
        return pl.BlockSpec((nb, L, E), lambda g: (g, 0, 0))

    # Weights/bias use a constant index_map -> fetched once and reused.
    # (pl.Buffered(1) would additionally halve their VMEM double-buffering;
    #  irrelevant at these sizes, so omitted for robustness.)
    w_spec = pl.BlockSpec((4, E, E), lambda g: (0, 0, 0))
    b_spec = pl.BlockSpec((1, E), lambda g: (0, 0))

    kernel = functools.partial(_mha_kernel, heads=heads, head_dim=head_dim, nb=nb)

    return pl.pallas_call(
        kernel,
        out_shape=jax.ShapeDtypeStruct((N, Ql, E), jnp.float32),
        grid_spec=pltpu.PrefetchScalarGridSpec(
            num_scalar_prefetch=0,
            grid=grid,
            in_specs=[act_spec(Ql), act_spec(Kl), act_spec(Vl), w_spec, b_spec],
            out_specs=pl.BlockSpec((nb, Ql, E), lambda g: (g, 0, 0)),
        ),
        compiler_params=pltpu.CompilerParams(
            dimension_semantics=("parallel",)),
    )(queries, keys, values, w_stack, b)


# ---------------------------------------------------------------------------
# Module wrapper (glue in plain JAX; weight prep is a one-time parameter fold)
# ---------------------------------------------------------------------------
class MultiHeadAttentionPallas:
    def __init__(self, embed_size, heads, key, compute_dtype=jnp.bfloat16):
        assert embed_size % heads == 0
        self.embed_size = embed_size
        self.heads = heads
        self.head_dim = embed_size // heads
        self.compute_dtype = compute_dtype
        D, E, H = self.head_dim, embed_size, heads
        ks = jax.random.split(key, 5)

        # nn.Linear weight layout: (out, in)
        self.wv = jax.random.normal(ks[0], (D, D), jnp.float32) * 0.05
        self.wk = jax.random.normal(ks[1], (D, D), jnp.float32) * 0.05
        self.wq = jax.random.normal(ks[2], (D, D), jnp.float32) * 0.05
        self.w_fc = jax.random.normal(ks[3], (E, E), jnp.float32) * 0.02
        self.b_fc = jax.random.normal(ks[4], (E,), jnp.float32) * 0.02

        # One-time folds, all in f32, cast to the compute dtype LAST:
        #   * block-diagonal per-head weights, pre-transposed to (in, out)
        #   * 1/sqrt(head_dim) softmax scale folded into the query weight
        #   * all four (E, E) weights stacked -> single kernel input / DMA
        eye = jnp.eye(H, dtype=jnp.float32)
        scale = 1.0 / (D ** 0.5)
        wq_bd = jnp.kron(eye, self.wq.T) * scale
        wk_bd = jnp.kron(eye, self.wk.T)
        wv_bd = jnp.kron(eye, self.wv.T)
        wfc_t = self.w_fc.T
        self.w_stack = jnp.stack([wq_bd, wk_bd, wv_bd, wfc_t]).astype(compute_dtype)
        self.b = self.b_fc.reshape(1, E)   # bias stays f32 (added post-acc)

    def __call__(self, values, keys, queries, batch_per_step=None):
        # No activation reshapes/transposes in the wrapper: (N, L, E) in/out.
        return mha_forward(queries, keys, values, self.w_stack, self.b,
                           heads=self.heads, head_dim=self.head_dim,
                           batch_per_step=batch_per_step)

    # pure-JAX f32 reference for validation (mask=False, dropout eval)
    def reference(self, values, keys, queries):
        N, Vl, _ = values.shape
        Kl, Ql = keys.shape[1], queries.shape[1]
        H, D = self.heads, self.head_dim
        v = values.reshape(N, Vl, H, D) @ self.wv.T
        k = keys.reshape(N, Kl, H, D) @ self.wk.T
        q = queries.reshape(N, Ql, H, D) @ self.wq.T
        att = jnp.einsum('nqhd,nkhd->nhqk', q, k)
        att = jax.nn.softmax(att / (D ** 0.5), axis=3)
        out = jnp.einsum('nhqk,nkhd->nqhd', att, v).reshape(N, Ql, H * D)
        return out @ self.w_fc.T + self.b_fc


if __name__ == "__main__":
    key = jax.random.PRNGKey(0)
    k_param, k_v, k_k, k_q = jax.random.split(key, 4)

    # small shapes consistent with the module: embed=256, heads=8 -> head_dim=32
    N, L, E, H = 2, 8, 256, 8
    mha = MultiHeadAttentionPallas(embed_size=E, heads=H, key=k_param)

    values = jax.random.normal(k_v, (N, L, E), jnp.float32)
    keys = jax.random.normal(k_k, (N, L, E), jnp.float32)
    queries = jax.random.normal(k_q, (N, L, E), jnp.float32)

    out = mha(values, keys, queries)
    jax.block_until_ready(out)

    ref = mha.reference(values, keys, queries)
    assert out.shape == (N, L, E), out.shape
    # bf16 MXU operands (f32 accumulation) -> slightly looser tolerance
    tol = 2e-3 if mha.compute_dtype == jnp.float32 else 8e-3
    assert jnp.allclose(out, ref, atol=tol, rtol=1e-2), \
        float(jnp.max(jnp.abs(out - ref)))

    print("KERNEL_OK")
</pallas_src>

<mosaic_0001>
module attributes {stable_mosaic.version = 11 : i64} {
  func.func @_mha_kernel(%arg0: i32, %arg1: memref<2x8x256xf32, #tpu.memory_space<vmem>>, %arg2: memref<2x8x256xf32, #tpu.memory_space<vmem>>, %arg3: memref<2x8x256xf32, #tpu.memory_space<vmem>>, %arg4: memref<4x256x256xbf16, #tpu.memory_space<vmem>>, %arg5: memref<1x256xf32, #tpu.memory_space<vmem>>, %arg6: memref<2x8x256xf32, #tpu.memory_space<vmem>>) attributes {dimension_semantics = [#tpu.dimension_semantics<parallel>], iteration_bounds = array<i64: 1>, scalar_prefetch = 0 : i64, scratch_operands = 0 : i64, tpu.core_type = #tpu.core_type<tc>, window_params = [{transform_indices = @transform_0, window_bounds = array<i64: 2, 8, 256>}, {transform_indices = @transform_1, window_bounds = array<i64: 2, 8, 256>}, {transform_indices = @transform_2, window_bounds = array<i64: 2, 8, 256>}, {pipeline_mode = #tpu.pipeline_mode<synchronous>, transform_indices = @transform_3, window_bounds = array<i64: 4, 256, 256>}, {pipeline_mode = #tpu.pipeline_mode<synchronous>, transform_indices = @transform_4, window_bounds = array<i64: 1, 256>}, {transform_indices = @transform_5, window_bounds = array<i64: 2, 8, 256>}]} {
    %c0 = arith.constant 0 : index
    %c0_0 = arith.constant 0 : index
    %c0_1 = arith.constant 0 : index
    %0 = vector.load %arg1[%c0, %c0_0, %c0_1] : memref<2x8x256xf32, #tpu.memory_space<vmem>>, vector<2x8x256xf32>
    %1 = vector.shape_cast %0 : vector<2x8x256xf32> to vector<16x256xf32>
    %2 = arith.truncf %1 : vector<16x256xf32> to vector<16x256xbf16>
    %c0_2 = arith.constant 0 : index
    %c0_3 = arith.constant 0 : index
    %c0_4 = arith.constant 0 : index
    %3 = vector.load %arg2[%c0_2, %c0_3, %c0_4] : memref<2x8x256xf32, #tpu.memory_space<vmem>>, vector<2x8x256xf32>
    %4 = vector.shape_cast %3 : vector<2x8x256xf32> to vector<16x256xf32>
    %5 = arith.truncf %4 : vector<16x256xf32> to vector<16x256xbf16>
    %c0_5 = arith.constant 0 : index
    %c0_6 = arith.constant 0 : index
    %c0_7 = arith.constant 0 : index
    %6 = vector.load %arg3[%c0_5, %c0_6, %c0_7] : memref<2x8x256xf32, #tpu.memory_space<vmem>>, vector<2x8x256xf32>
    %7 = vector.shape_cast %6 : vector<2x8x256xf32> to vector<16x256xf32>
    %8 = arith.truncf %7 : vector<16x256xf32> to vector<16x256xbf16>
    %c0_8 = arith.constant 0 : index
    %c0_9 = arith.constant 0 : index
    %c0_10 = arith.constant 0 : index
    %9 = vector.load %arg4[%c0_8, %c0_9, %c0_10] : memref<4x256x256xbf16, #tpu.memory_space<vmem>>, vector<1x256x256xbf16>
    %10 = vector.shape_cast %9 : vector<1x256x256xbf16> to vector<256x256xbf16>
    %cst = arith.constant dense<0.000000e+00> : vector<16x256xf32>
    %11 = tpu.matmul %2, %10, %cst {dimension_numbers = #tpu.dot_dimension_numbers<[1], [0], [0], [1], [0, 0, 1, 1], [], []>} : vector<16x256xbf16>, vector<256x256xbf16>, vector<16x256xf32> -> vector<16x256xf32>
    %c1 = arith.constant 1 : index
    %c0_11 = arith.constant 0 : index
    %c0_12 = arith.constant 0 : index
    %12 = vector.load %arg4[%c1, %c0_11, %c0_12] : memref<4x256x256xbf16, #tpu.memory_space<vmem>>, vector<1x256x256xbf16>
    %13 = vector.shape_cast %12 : vector<1x256x256xbf16> to vector<256x256xbf16>
    %cst_13 = arith.constant dense<0.000000e+00> : vector<16x256xf32>
    %14 = tpu.matmul %5, %13, %cst_13 {dimension_numbers = #tpu.dot_dimension_numbers<[1], [0], [0], [1], [0, 0, 1, 1], [], []>} : vector<16x256xbf16>, vector<256x256xbf16>, vector<16x256xf32> -> vector<16x256xf32>
    %c2 = arith.constant 2 : index
    %c0_14 = arith.constant 0 : index
    %c0_15 = arith.constant 0 : index
    %15 = vector.load %arg4[%c2, %c0_14, %c0_15] : memref<4x256x256xbf16, #tpu.memory_space<vmem>>, vector<1x256x256xbf16>
    %16 = vector.shape_cast %15 : vector<1x256x256xbf16> to vector<256x256xbf16>
    %cst_16 = arith.constant dense<0.000000e+00> : vector<16x256xf32>
    %17 = tpu.matmul %8, %16, %cst_16 {dimension_numbers = #tpu.dot_dimension_numbers<[1], [0], [0], [1], [0, 0, 1, 1], [], []>} : vector<16x256xbf16>, vector<256x256xbf16>, vector<16x256xf32> -> vector<16x256xf32>
    %c3 = arith.constant 3 : index
    %c0_17 = arith.constant 0 : index
    %c0_18 = arith.constant 0 : index
    %18 = vector.load %arg4[%c3, %c0_17, %c0_18] : memref<4x256x256xbf16, #tpu.memory_space<vmem>>, vector<1x256x256xbf16>
    %19 = vector.shape_cast %18 : vector<1x256x256xbf16> to vector<256x256xbf16>
    %c0_19 = arith.constant 0 : index
    %c0_20 = arith.constant 0 : index
    %20 = vector.load %arg5[%c0_19, %c0_20] : memref<1x256xf32, #tpu.memory_space<vmem>>, vector<1x256xf32>
    %cst_21 = arith.constant 0.000000e+00 : f32
    %21 = vector.broadcast %cst_21 : f32 to vector<8x256xf32>
    %22 = vector.extract_strided_slice %11 {offsets = [0, 0], sizes = [8, 32], strides = [1, 1]} : vector<16x256xf32> to vector<8x32xf32>
    %23 = vector.extract_strided_slice %14 {offsets = [0, 0], sizes = [8, 32], strides = [1, 1]} : vector<16x256xf32> to vector<8x32xf32>
    %24 = vector.extract_strided_slice %17 {offsets = [0, 0], sizes = [8, 32], strides = [1, 1]} : vector<16x256xf32> to vector<8x32xf32>
    %cst_22 = arith.constant dense<0.000000e+00> : vector<8x8xf32>
    %25 = tpu.matmul %22, %23, %cst_22 {dimension_numbers = #tpu.dot_dimension_numbers<[1], [1], [0], [0], [0, 0, 1, 0], [], []>} : vector<8x32xf32>, vector<8x32xf32>, vector<8x8xf32> -> vector<8x8xf32>
    %cst_23 = arith.constant dense<0xFF800000> : vector<8xf32>
    %26 = vector.multi_reduction <maximumf>, %25, %cst_23 [1] : vector<8x8xf32> to vector<8xf32>
    %27 = vector.shape_cast %26 : vector<8xf32> to vector<8x1xf32>
    %28 = vector.broadcast %27 : vector<8x1xf32> to vector<8x8xf32>
    %29 = arith.subf %25, %28 : vector<8x8xf32>
    %30 = math.exp %29 : vector<8x8xf32>
    %cst_24 = arith.constant dense<0.000000e+00> : vector<8xf32>
    %31 = vector.multi_reduction <add>, %30, %cst_24 [1] : vector<8x8xf32> to vector<8xf32>
    %32 = vector.shape_cast %31 : vector<8xf32> to vector<8x1xf32>
    %33 = vector.broadcast %32 : vector<8x1xf32> to vector<8x8xf32>
    %34 = arith.divf %30, %33 : vector<8x8xf32>
    %35 = arith.truncf %34 : vector<8x8xf32> to vector<8x8xbf16>
    %36 = arith.truncf %24 : vector<8x32xf32> to vector<8x32xbf16>
    %cst_25 = arith.constant dense<0.000000e+00> : vector<8x32xf32>
    %37 = tpu.matmul %35, %36, %cst_25 {dimension_numbers = #tpu.dot_dimension_numbers<[1], [0], [0], [1], [0, 0, 1, 1], [], []>} : vector<8x8xbf16>, vector<8x32xbf16>, vector<8x32xf32> -> vector<8x32xf32>
    %38 = arith.truncf %37 : vector<8x32xf32> to vector<8x32xbf16>
    %39 = vector.extract_strided_slice %19 {offsets = [0, 0], sizes = [32, 256], strides = [1, 1]} : vector<256x256xbf16> to vector<32x256xbf16>
    %cst_26 = arith.constant dense<0.000000e+00> : vector<8x256xf32>
    %40 = tpu.matmul %38, %39, %cst_26 {dimension_numbers = #tpu.dot_dimension_numbers<[1], [0], [0], [1], [0, 0, 1, 1], [], []>} : vector<8x32xbf16>, vector<32x256xbf16>, vector<8x256xf32> -> vector<8x256xf32>
    %41 = arith.addf %21, %40 : vector<8x256xf32>
    %42 = vector.extract_strided_slice %11 {offsets = [0, 32], sizes = [8, 32], strides = [1, 1]} : vector<16x256xf32> to vector<8x32xf32>
    %43 = vector.extract_strided_slice %14 {offsets = [0, 32], sizes = [8, 32], strides = [1, 1]} : vector<16x256xf32> to vector<8x32xf32>
    %44 = vector.extract_strided_slice %17 {offsets = [0, 32], sizes = [8, 32], strides = [1, 1]} : vector<16x256xf32> to vector<8x32xf32>
    %cst_27 = arith.constant dense<0.000000e+00> : vector<8x8xf32>
    %45 = tpu.matmul %42, %43, %cst_27 {dimension_numbers = #tpu.dot_dimension_numbers<[1], [1], [0], [0], [0, 0, 1, 0], [], []>} : vector<8x32xf32>, vector<8x32xf32>, vector<8x8xf32> -> vector<8x8xf32>
    %cst_28 = arith.constant dense<0xFF800000> : vector<8xf32>
    %46 = vector.multi_reduction <maximumf>, %45, %cst_28 [1] : vector<8x8xf32> to vector<8xf32>
    %47 = vector.shape_cast %46 : vector<8xf32> to vector<8x1xf32>
    %48 = vector.broadcast %47 : vector<8x1xf32> to vector<8x8xf32>
    %49 = arith.subf %45, %48 : vector<8x8xf32>
    %50 = math.exp %49 : vector<8x8xf32>
    %cst_29 = arith.constant dense<0.000000e+00> : vector<8xf32>
    %51 = vector.multi_reduction <add>, %50, %cst_29 [1] : vector<8x8xf32> to vector<8xf32>
    %52 = vector.shape_cast %51 : vector<8xf32> to vector<8x1xf32>
    %53 = vector.broadcast %52 : vector<8x1xf32> to vector<8x8xf32>
    %54 = arith.divf %50, %53 : vector<8x8xf32>
    %55 = arith.truncf %54 : vector<8x8xf32> to vector<8x8xbf16>
    %56 = arith.truncf %44 : vector<8x32xf32> to vector<8x32xbf16>
    %cst_30 = arith.constant dense<0.000000e+00> : vector<8x32xf32>
    %57 = tpu.matmul %55, %56, %cst_30 {dimension_numbers = #tpu.dot_dimension_numbers<[1], [0], [0], [1], [0, 0, 1, 1], [], []>} : vector<8x8xbf16>, vector<8x32xbf16>, vector<8x32xf32> -> vector<8x32xf32>
    %58 = arith.truncf %57 : vector<8x32xf32> to vector<8x32xbf16>
    %59 = vector.extract_strided_slice %19 {offsets = [32, 0], sizes = [32, 256], strides = [1, 1]} : vector<256x256xbf16> to vector<32x256xbf16>
    %cst_31 = arith.constant dense<0.000000e+00> : vector<8x256xf32>
    %60 = tpu.matmul %58, %59, %cst_31 {dimension_numbers = #tpu.dot_dimension_numbers<[1], [0], [0], [1], [0, 0, 1, 1], [], []>} : vector<8x32xbf16>, vector<32x256xbf16>, vector<8x256xf32> -> vector<8x256xf32>
    %61 = arith.addf %41, %60 : vector<8x256xf32>
    %62 = vector.extract_strided_slice %11 {offsets = [0, 64], sizes = [8, 32], strides = [1, 1]} : vector<16x256xf32> to vector<8x32xf32>
    %63 = vector.extract_strided_slice %14 {offsets = [0, 64], sizes = [8, 32], strides = [1, 1]} : vector<16x256xf32> to vector<8x32xf32>
    %64 = vector.extract_strided_slice %17 {offsets = [0, 64], sizes = [8, 32], strides = [1, 1]} : vector<16x256xf32> to vector<8x32xf32>
    %cst_32 = arith.constant dense<0.000000e+00> : vector<8x8xf32>
    %65 = tpu.matmul %62, %63, %cst_32 {dimension_numbers = #tpu.dot_dimension_numbers<[1], [1], [0], [0], [0, 0, 1, 0], [], []>} : vector<8x32xf32>, vector<8x32xf32>, vector<8x8xf32> -> vector<8x8xf32>
    %cst_33 = arith.constant dense<0xFF800000> : vector<8xf32>
    %66 = vector.multi_reduction <maximumf>, %65, %cst_33 [1] : vector<8x8xf32> to vector<8xf32>
    %67 = vector.shape_cast %66 : vector<8xf32> to vector<8x1xf32>
    %68 = vector.broadcast %67 : vector<8x1xf32> to vector<8x8xf32>
    %69 = arith.subf %65, %68 : vector<8x8xf32>
    %70 = math.exp %69 : vector<8x8xf32>
    %cst_34 = arith.constant dense<0.000000e+00> : vector<8xf32>
    %71 = vector.multi_reduction <add>, %70, %cst_34 [1] : vector<8x8xf32> to vector<8xf32>
    %72 = vector.shape_cast %71 : vector<8xf32> to vector<8x1xf32>
    %73 = vector.broadcast %72 : vector<8x1xf32> to vector<8x8xf32>
    %74 = arith.divf %70, %73 : vector<8x8xf32>
    %75 = arith.truncf %74 : vector<8x8xf32> to vector<8x8xbf16>
    %76 = arith.truncf %64 : vector<8x32xf32> to vector<8x32xbf16>
    %cst_35 = arith.constant dense<0.000000e+00> : vector<8x32xf32>
    %77 = tpu.matmul %75, %76, %cst_35 {dimension_numbers = #tpu.dot_dimension_numbers<[1], [0], [0], [1], [0, 0, 1, 1], [], []>} : vector<8x8xbf16>, vector<8x32xbf16>, vector<8x32xf32> -> vector<8x32xf32>
    %78 = arith.truncf %77 : vector<8x32xf32> to vector<8x32xbf16>
    %79 = vector.extract_strided_slice %19 {offsets = [64, 0], sizes = [32, 256], strides = [1, 1]} : vector<256x256xbf16> to vector<32x256xbf16>
    %cst_36 = arith.constant dense<0.000000e+00> : vector<8x256xf32>
    %80 = tpu.matmul %78, %79, %cst_36 {dimension_numbers = #tpu.dot_dimension_numbers<[1], [0], [0], [1], [0, 0, 1, 1], [], []>} : vector<8x32xbf16>, vector<32x256xbf16>, vector<8x256xf32> -> vector<8x256xf32>
    %81 = arith.addf %61, %80 : vector<8x256xf32>
    %82 = vector.extract_strided_slice %11 {offsets = [0, 96], sizes = [8, 32], strides = [1, 1]} : vector<16x256xf32> to vector<8x32xf32>
    %83 = vector.extract_strided_slice %14 {offsets = [0, 96], sizes = [8, 32], strides = [1, 1]} : vector<16x256xf32> to vector<8x32xf32>
    %84 = vector.extract_strided_slice %17 {offsets = [0, 96], sizes = [8, 32], strides = [1, 1]} : vector<16x256xf32> to vector<8x32xf32>
    %cst_37 = arith.constant dense<0.000000e+00> : vector<8x8xf32>
    %85 = tpu.matmul %82, %83, %cst_37 {dimension_numbers = #tpu.dot_dimension_numbers<[1], [1], [0], [0], [0, 0, 1, 0], [], []>} : vector<8x32xf32>, vector<8x32xf32>, vector<8x8xf32> -> vector<8x8xf32>
    %cst_38 = arith.constant dense<0xFF800000> : vector<8xf32>
    %86 = vector.multi_reduction <maximumf>, %85, %cst_38 [1] : vector<8x8xf32> to vector<8xf32>
    %87 = vector.shape_cast %86 : vector<8xf32> to vector<8x1xf32>
    %88 = vector.broadcast %87 : vector<8x1xf32> to vector<8x8xf32>
    %89 = arith.subf %85, %88 : vector<8x8xf32>
    %90 = math.exp %89 : vector<8x8xf32>
    %cst_39 = arith.constant dense<0.000000e+00> : vector<8xf32>
    %91 = vector.multi_reduction <add>, %90, %cst_39 [1] : vector<8x8xf32> to vector<8xf32>
    %92 = vector.shape_cast %91 : vector<8xf32> to vector<8x1xf32>
    %93 = vector.broadcast %92 : vector<8x1xf32> to vector<8x8xf32>
    %94 = arith.divf %90, %93 : vector<8x8xf32>
    %95 = arith.truncf %94 : vector<8x8xf32> to vector<8x8xbf16>
    %96 = arith.truncf %84 : vector<8x32xf32> to vector<8x32xbf16>
    %cst_40 = arith.constant dense<0.000000e+00> : vector<8x32xf32>
    %97 = tpu.matmul %95, %96, %cst_40 {dimension_numbers = #tpu.dot_dimension_numbers<[1], [0], [0], [1], [0, 0, 1, 1], [], []>} : vector<8x8xbf16>, vector<8x32xbf16>, vector<8x32xf32> -> vector<8x32xf32>
    %98 = arith.truncf %97 : vector<8x32xf32> to vector<8x32xbf16>
    %99 = vector.extract_strided_slice %19 {offsets = [96, 0], sizes = [32, 256], strides = [1, 1]} : vector<256x256xbf16> to vector<32x256xbf16>
    %cst_41 = arith.constant dense<0.000000e+00> : vector<8x256xf32>
    %100 = tpu.matmul %98, %99, %cst_41 {dimension_numbers = #tpu.dot_dimension_numbers<[1], [0], [0], [1], [0, 0, 1, 1], [], []>} : vector<8x32xbf16>, vector<32x256xbf16>, vector<8x256xf32> -> vector<8x256xf32>
    %101 = arith.addf %81, %100 : vector<8x256xf32>
    %102 = vector.extract_strided_slice %11 {offsets = [0, 128], sizes = [8, 32], strides = [1, 1]} : vector<16x256xf32> to vector<8x32xf32>
    %103 = vector.extract_strided_slice %14 {offsets = [0, 128], sizes = [8, 32], strides = [1, 1]} : vector<16x256xf32> to vector<8x32xf32>
    %104 = vector.extract_strided_slice %17 {offsets = [0, 128], sizes = [8, 32], strides = [1, 1]} : vector<16x256xf32> to vector<8x32xf32>
    %cst_42 = arith.constant dense<0.000000e+00> : vector<8x8xf32>
    %105 = tpu.matmul %102, %103, %cst_42 {dimension_numbers = #tpu.dot_dimension_numbers<[1], [1], [0], [0], [0, 0, 1, 0], [], []>} : vector<8x32xf32>, vector<8x32xf32>, vector<8x8xf32> -> vector<8x8xf32>
    %cst_43 = arith.constant dense<0xFF800000> : vector<8xf32>
    %106 = vector.multi_reduction <maximumf>, %105, %cst_43 [1] : vector<8x8xf32> to vector<8xf32>
    %107 = vector.shape_cast %106 : vector<8xf32> to vector<8x1xf32>
    %108 = vector.broadcast %107 : vector<8x1xf32> to vector<8x8xf32>
    %109 = arith.subf %105, %108 : vector<8x8xf32>
    %110 = math.exp %109 : vector<8x8xf32>
    %cst_44 = arith.constant dense<0.000000e+00> : vector<8xf32>
    %111 = vector.multi_reduction <add>, %110, %cst_44 [1] : vector<8x8xf32> to vector<8xf32>
    %112 = vector.shape_cast %111 : vector<8xf32> to vector<8x1xf32>
    %113 = vector.broadcast %112 : vector<8x1xf32> to vector<8x8xf32>
    %114 = arith.divf %110, %113 : vector<8x8xf32>
    %115 = arith.truncf %114 : vector<8x8xf32> to vector<8x8xbf16>
    %116 = arith.truncf %104 : vector<8x32xf32> to vector<8x32xbf16>
    %cst_45 = arith.constant dense<0.000000e+00> : vector<8x32xf32>
    %117 = tpu.matmul %115, %116, %cst_45 {dimension_numbers = #tpu.dot_dimension_numbers<[1], [0], [0], [1], [0, 0, 1, 1], [], []>} : vector<8x8xbf16>, vector<8x32xbf16>, vector<8x32xf32> -> vector<8x32xf32>
    %118 = arith.truncf %117 : vector<8x32xf32> to vector<8x32xbf16>
    %119 = vector.extract_strided_slice %19 {offsets = [128, 0], sizes = [32, 256], strides = [1, 1]} : vector<256x256xbf16> to vector<32x256xbf16>
    %cst_46 = arith.constant dense<0.000000e+00> : vector<8x256xf32>
    %120 = tpu.matmul %118, %119, %cst_46 {dimension_numbers = #tpu.dot_dimension_numbers<[1], [0], [0], [1], [0, 0, 1, 1], [], []>} : vector<8x32xbf16>, vector<32x256xbf16>, vector<8x256xf32> -> vector<8x256xf32>
    %121 = arith.addf %101, %120 : vector<8x256xf32>
    %122 = vector.extract_strided_slice %11 {offsets = [0, 160], sizes = [8, 32], strides = [1, 1]} : vector<16x256xf32> to vector<8x32xf32>
    %123 = vector.extract_strided_slice %14 {offsets = [0, 160], sizes = [8, 32], strides = [1, 1]} : vector<16x256xf32> to vector<8x32xf32>
    %124 = vector.extract_strided_slice %17 {offsets = [0, 160], sizes = [8, 32], strides = [1, 1]} : vector<16x256xf32> to vector<8x32xf32>
    %cst_47 = arith.constant dense<0.000000e+00> : vector<8x8xf32>
    %125 = tpu.matmul %122, %123, %cst_47 {dimension_numbers = #tpu.dot_dimension_numbers<[1], [1], [0], [0], [0, 0, 1, 0], [], []>} : vector<8x32xf32>, vector<8x32xf32>, vector<8x8xf32> -> vector<8x8xf32>
    %cst_48 = arith.constant dense<0xFF800000> : vector<8xf32>
    %126 = vector.multi_reduction <maximumf>, %125, %cst_48 [1] : vector<8x8xf32> to vector<8xf32>
    %127 = vector.shape_cast %126 : vector<8xf32> to vector<8x1xf32>
    %128 = vector.broadcast %127 : vector<8x1xf32> to vector<8x8xf32>
    %129 = arith.subf %125, %128 : vector<8x8xf32>
    %130 = math.exp %129 : vector<8x8xf32>
    %cst_49 = arith.constant dense<0.000000e+00> : vector<8xf32>
    %131 = vector.multi_reduction <add>, %130, %cst_49 [1] : vector<8x8xf32> to vector<8xf32>
    %132 = vector.shape_cast %131 : vector<8xf32> to vector<8x1xf32>
    %133 = vector.broadcast %132 : vector<8x1xf32> to vector<8x8xf32>
    %134 = arith.divf %130, %133 : vector<8x8xf32>
    %135 = arith.truncf %134 : vector<8x8xf32> to vector<8x8xbf16>
    %136 = arith.truncf %124 : vector<8x32xf32> to vector<8x32xbf16>
    %cst_50 = arith.constant dense<0.000000e+00> : vector<8x32xf32>
    %137 = tpu.matmul %135, %136, %cst_50 {dimension_numbers = #tpu.dot_dimension_numbers<[1], [0], [0], [1], [0, 0, 1, 1], [], []>} : vector<8x8xbf16>, vector<8x32xbf16>, vector<8x32xf32> -> vector<8x32xf32>
    %138 = arith.truncf %137 : vector<8x32xf32> to vector<8x32xbf16>
    %139 = vector.extract_strided_slice %19 {offsets = [160, 0], sizes = [32, 256], strides = [1, 1]} : vector<256x256xbf16> to vector<32x256xbf16>
    %cst_51 = arith.constant dense<0.000000e+00> : vector<8x256xf32>
    %140 = tpu.matmul %138, %139, %cst_51 {dimension_numbers = #tpu.dot_dimension_numbers<[1], [0], [0], [1], [0, 0, 1, 1], [], []>} : vector<8x32xbf16>, vector<32x256xbf16>, vector<8x256xf32> -> vector<8x256xf32>
    %141 = arith.addf %121, %140 : vector<8x256xf32>
    %142 = vector.extract_strided_slice %11 {offsets = [0, 192], sizes = [8, 32], strides = [1, 1]} : vector<16x256xf32> to vector<8x32xf32>
    %143 = vector.extract_strided_slice %14 {offsets = [0, 192], sizes = [8, 32], strides = [1, 1]} : vector<16x256xf32> to vector<8x32xf32>
    %144 = vector.extract_strided_slice %17 {offsets = [0, 192], sizes = [8, 32], strides = [1, 1]} : vector<16x256xf32> to vector<8x32xf32>
    %cst_52 = arith.constant dense<0.000000e+00> : vector<8x8xf32>
    %145 = tpu.matmul %142, %143, %cst_52 {dimension_numbers = #tpu.dot_dimension_numbers<[1], [1], [0], [0], [0, 0, 1, 0], [], []>} : vector<8x32xf32>, vector<8x32xf32>, vector<8x8xf32> -> vector<8x8xf32>
    %cst_53 = arith.constant dense<0xFF800000> : vector<8xf32>
    %146 = vector.multi_reduction <maximumf>, %145, %cst_53 [1] : vector<8x8xf32> to vector<8xf32>
    %147 = vector.shape_cast %146 : vector<8xf32> to vector<8x1xf32>
    %148 = vector.broadcast %147 : vector<8x1xf32> to vector<8x8xf32>
    %149 = arith.subf %145, %148 : vector<8x8xf32>
    %150 = math.exp %149 : vector<8x8xf32>
    %cst_54 = arith.constant dense<0.000000e+00> : vector<8xf32>
    %151 = vector.multi_reduction <add>, %150, %cst_54 [1] : vector<8x8xf32> to vector<8xf32>
    %152 = vector.shape_cast %151 : vector<8xf32> to vector<8x1xf32>
    %153 = vector.broadcast %152 : vector<8x1xf32> to vector<8x8xf32>
    %154 = arith.divf %150, %153 : vector<8x8xf32>
    %155 = arith.truncf %154 : vector<8x8xf32> to vector<8x8xbf16>
    %156 = arith.truncf %144 : vector<8x32xf32> to vector<8x32xbf16>
    %cst_55 = arith.constant dense<0.000000e+00> : vector<8x32xf32>
    %157 = tpu.matmul %155, %156, %cst_55 {dimension_numbers = #tpu.dot_dimension_numbers<[1], [0], [0], [1], [0, 0, 1, 1], [], []>} : vector<8x8xbf16>, vector<8x32xbf16>, vector<8x32xf32> -> vector<8x32xf32>
    %158 = arith.truncf %157 : vector<8x32xf32> to vector<8x32xbf16>
    %159 = vector.extract_strided_slice %19 {offsets = [192, 0], sizes = [32, 256], strides = [1, 1]} : vector<256x256xbf16> to vector<32x256xbf16>
    %cst_56 = arith.constant dense<0.000000e+00> : vector<8x256xf32>
    %160 = tpu.matmul %158, %159, %cst_56 {dimension_numbers = #tpu.dot_dimension_numbers<[1], [0], [0], [1], [0, 0, 1, 1], [], []>} : vector<8x32xbf16>, vector<32x256xbf16>, vector<8x256xf32> -> vector<8x256xf32>
    %161 = arith.addf %141, %160 : vector<8x256xf32>
    %162 = vector.extract_strided_slice %11 {offsets = [0, 224], sizes = [8, 32], strides = [1, 1]} : vector<16x256xf32> to vector<8x32xf32>
    %163 = vector.extract_strided_slice %14 {offsets = [0, 224], sizes = [8, 32], strides = [1, 1]} : vector<16x256xf32> to vector<8x32xf32>
    %164 = vector.extract_strided_slice %17 {offsets = [0, 224], sizes = [8, 32], strides = [1, 1]} : vector<16x256xf32> to vector<8x32xf32>
    %cst_57 = arith.constant dense<0.000000e+00> : vector<8x8xf32>
    %165 = tpu.matmul %162, %163, %cst_57 {dimension_numbers = #tpu.dot_dimension_numbers<[1], [1], [0], [0], [0, 0, 1, 0], [], []>} : vector<8x32xf32>, vector<8x32xf32>, vector<8x8xf32> -> vector<8x8xf32>
    %cst_58 = arith.constant dense<0xFF800000> : vector<8xf32>
    %166 = vector.multi_reduction <maximumf>, %165, %cst_58 [1] : vector<8x8xf32> to vector<8xf32>
    %167 = vector.shape_cast %166 : vector<8xf32> to vector<8x1xf32>
    %168 = vector.broadcast %167 : vector<8x1xf32> to vector<8x8xf32>
    %169 = arith.subf %165, %168 : vector<8x8xf32>
    %170 = math.exp %169 : vector<8x8xf32>
    %cst_59 = arith.constant dense<0.000000e+00> : vector<8xf32>
    %171 = vector.multi_reduction <add>, %170, %cst_59 [1] : vector<8x8xf32> to vector<8xf32>
    %172 = vector.shape_cast %171 : vector<8xf32> to vector<8x1xf32>
    %173 = vector.broadcast %172 : vector<8x1xf32> to vector<8x8xf32>
    %174 = arith.divf %170, %173 : vector<8x8xf32>
    %175 = arith.truncf %174 : vector<8x8xf32> to vector<8x8xbf16>
    %176 = arith.truncf %164 : vector<8x32xf32> to vector<8x32xbf16>
    %cst_60 = arith.constant dense<0.000000e+00> : vector<8x32xf32>
    %177 = tpu.matmul %175, %176, %cst_60 {dimension_numbers = #tpu.dot_dimension_numbers<[1], [0], [0], [1], [0, 0, 1, 1], [], []>} : vector<8x8xbf16>, vector<8x32xbf16>, vector<8x32xf32> -> vector<8x32xf32>
    %178 = arith.truncf %177 : vector<8x32xf32> to vector<8x32xbf16>
    %179 = vector.extract_strided_slice %19 {offsets = [224, 0], sizes = [32, 256], strides = [1, 1]} : vector<256x256xbf16> to vector<32x256xbf16>
    %cst_61 = arith.constant dense<0.000000e+00> : vector<8x256xf32>
    %180 = tpu.matmul %178, %179, %cst_61 {dimension_numbers = #tpu.dot_dimension_numbers<[1], [0], [0], [1], [0, 0, 1, 1], [], []>} : vector<8x32xbf16>, vector<32x256xbf16>, vector<8x256xf32> -> vector<8x256xf32>
    %181 = arith.addf %161, %180 : vector<8x256xf32>
    %182 = vector.broadcast %20 : vector<1x256xf32> to vector<8x256xf32>
    %183 = arith.addf %181, %182 : vector<8x256xf32>
    %c0_62 = arith.constant 0 : index
    %c0_63 = arith.constant 0 : index
    %c0_64 = arith.constant 0 : index
    %184 = vector.load %arg6[%c0_62, %c0_63, %c0_64] : memref<2x8x256xf32, #tpu.memory_space<vmem>>, vector<1x8x256xf32>
    %185 = vector.shape_cast %184 : vector<1x8x256xf32> to vector<8x256xf32>
    %186 = vector.shape_cast %183 : vector<8x256xf32> to vector<1x8x256xf32>
    tpu.vector_store %arg6[%c0_62, %c0_63, %c0_64], %186 {strides = array<i32>} : memref<2x8x256xf32, #tpu.memory_space<vmem>>, vector<1x8x256xf32>,
    %cst_65 = arith.constant 0.000000e+00 : f32
    %187 = vector.broadcast %cst_65 : f32 to vector<8x256xf32>
    %188 = vector.extract_strided_slice %11 {offsets = [8, 0], sizes = [8, 32], strides = [1, 1]} : vector<16x256xf32> to vector<8x32xf32>
    %189 = vector.extract_strided_slice %14 {offsets = [8, 0], sizes = [8, 32], strides = [1, 1]} : vector<16x256xf32> to vector<8x32xf32>
    %190 = vector.extract_strided_slice %17 {offsets = [8, 0], sizes = [8, 32], strides = [1, 1]} : vector<16x256xf32> to vector<8x32xf32>
    %cst_66 = arith.constant dense<0.000000e+00> : vector<8x8xf32>
    %191 = tpu.matmul %188, %189, %cst_66 {dimension_numbers = #tpu.dot_dimension_numbers<[1], [1], [0], [0], [0, 0, 1, 0], [], []>} : vector<8x32xf32>, vector<8x32xf32>, vector<8x8xf32> -> vector<8x8xf32>
    %cst_67 = arith.constant dense<0xFF800000> : vector<8xf32>
    %192 = vector.multi_reduction <maximumf>, %191, %cst_67 [1] : vector<8x8xf32> to vector<8xf32>
    %193 = vector.shape_cast %192 : vector<8xf32> to vector<8x1xf32>
    %194 = vector.broadcast %193 : vector<8x1xf32> to vector<8x8xf32>
    %195 = arith.subf %191, %194 : vector<8x8xf32>
    %196 = math.exp %195 : vector<8x8xf32>
    %cst_68 = arith.constant dense<0.000000e+00> : vector<8xf32>
    %197 = vector.multi_reduction <add>, %196, %cst_68 [1] : vector<8x8xf32> to vector<8xf32>
    %198 = vector.shape_cast %197 : vector<8xf32> to vector<8x1xf32>
    %199 = vector.broadcast %198 : vector<8x1xf32> to vector<8x8xf32>
    %200 = arith.divf %196, %199 : vector<8x8xf32>
    %201 = arith.truncf %200 : vector<8x8xf32> to vector<8x8xbf16>
    %202 = arith.truncf %190 : vector<8x32xf32> to vector<8x32xbf16>
    %cst_69 = arith.constant dense<0.000000e+00> : vector<8x32xf32>
    %203 = tpu.matmul %201, %202, %cst_69 {dimension_numbers = #tpu.dot_dimension_numbers<[1], [0], [0], [1], [0, 0, 1, 1], [], []>} : vector<8x8xbf16>, vector<8x32xbf16>, vector<8x32xf32> -> vector<8x32xf32>
    %204 = arith.truncf %203 : vector<8x32xf32> to vector<8x32xbf16>
    %205 = vector.extract_strided_slice %19 {offsets = [0, 0], sizes = [32, 256], strides = [1, 1]} : vector<256x256xbf16> to vector<32x256xbf16>
    %cst_70 = arith.constant dense<0.000000e+00> : vector<8x256xf32>
    %206 = tpu.matmul %204, %205, %cst_70 {dimension_numbers = #tpu.dot_dimension_numbers<[1], [0], [0], [1], [0, 0, 1, 1], [], []>} : vector<8x32xbf16>, vector<32x256xbf16>, vector<8x256xf32> -> vector<8x256xf32>
    %207 = arith.addf %187, %206 : vector<8x256xf32>
    %208 = vector.extract_strided_slice %11 {offsets = [8, 32], sizes = [8, 32], strides = [1, 1]} : vector<16x256xf32> to vector<8x32xf32>
    %209 = vector.extract_strided_slice %14 {offsets = [8, 32], sizes = [8, 32], strides = [1, 1]} : vector<16x256xf32> to vector<8x32xf32>
    %210 = vector.extract_strided_slice %17 {offsets = [8, 32], sizes = [8, 32], strides = [1, 1]} : vector<16x256xf32> to vector<8x32xf32>
    %cst_71 = arith.constant dense<0.000000e+00> : vector<8x8xf32>
    %211 = tpu.matmul %208, %209, %cst_71 {dimension_numbers = #tpu.dot_dimension_numbers<[1], [1], [0], [0], [0, 0, 1, 0], [], []>} : vector<8x32xf32>, vector<8x32xf32>, vector<8x8xf32> -> vector<8x8xf32>
    %cst_72 = arith.constant dense<0xFF800000> : vector<8xf32>
    %212 = vector.multi_reduction <maximumf>, %211, %cst_72 [1] : vector<8x8xf32> to vector<8xf32>
    %213 = vector.shape_cast %212 : vector<8xf32> to vector<8x1xf32>
    %214 = vector.broadcast %213 : vector<8x1xf32> to vector<8x8xf32>
    %215 = arith.subf %211, %214 : vector<8x8xf32>
    %216 = math.exp %215 : vector<8x8xf32>
    %cst_73 = arith.constant dense<0.000000e+00> : vector<8xf32>
    %217 = vector.multi_reduction <add>, %216, %cst_73 [1] : vector<8x8xf32> to vector<8xf32>
    %218 = vector.shape_cast %217 : vector<8xf32> to vector<8x1xf32>
    %219 = vector.broadcast %218 : vector<8x1xf32> to vector<8x8xf32>
    %220 = arith.divf %216, %219 : vector<8x8xf32>
    %221 = arith.truncf %220 : vector<8x8xf32> to vector<8x8xbf16>
    %222 = arith.truncf %210 : vector<8x32xf32> to vector<8x32xbf16>
    %cst_74 = arith.constant dense<0.000000e+00> : vector<8x32xf32>
    %223 = tpu.matmul %221, %222, %cst_74 {dimension_numbers = #tpu.dot_dimension_numbers<[1], [0], [0], [1], [0, 0, 1, 1], [], []>} : vector<8x8xbf16>, vector<8x32xbf16>, vector<8x32xf32> -> vector<8x32xf32>
    %224 = arith.truncf %223 : vector<8x32xf32> to vector<8x32xbf16>
    %225 = vector.extract_strided_slice %19 {offsets = [32, 0], sizes = [32, 256], strides = [1, 1]} : vector<256x256xbf16> to vector<32x256xbf16>
    %cst_75 = arith.constant dense<0.000000e+00> : vector<8x256xf32>
    %226 = tpu.matmul %224, %225, %cst_75 {dimension_numbers = #tpu.dot_dimension_numbers<[1], [0], [0], [1], [0, 0, 1, 1], [], []>} : vector<8x32xbf16>, vector<32x256xbf16>, vector<8x256xf32> -> vector<8x256xf32>
    %227 = arith.addf %207, %226 : vector<8x256xf32>
    %228 = vector.extract_strided_slice %11 {offsets = [8, 64], sizes = [8, 32], strides = [1, 1]} : vector<16x256xf32> to vector<8x32xf32>
    %229 = vector.extract_strided_slice %14 {offsets = [8, 64], sizes = [8, 32], strides = [1, 1]} : vector<16x256xf32> to vector<8x32xf32>
    %230 = vector.extract_strided_slice %17 {offsets = [8, 64], sizes = [8, 32], strides = [1, 1]} : vector<16x256xf32> to vector<8x32xf32>
    %cst_76 = arith.constant dense<0.000000e+00> : vector<8x8xf32>
    %231 = tpu.matmul %228, %229, %cst_76 {dimension_numbers = #tpu.dot_dimension_numbers<[1], [1], [0], [0], [0, 0, 1, 0], [], []>} : vector<8x32xf32>, vector<8x32xf32>, vector<8x8xf32> -> vector<8x8xf32>
    %cst_77 = arith.constant dense<0xFF800000> : vector<8xf32>
    %232 = vector.multi_reduction <maximumf>, %231, %cst_77 [1] : vector<8x8xf32> to vector<8xf32>
    %233 = vector.shape_cast %232 : vector<8xf32> to vector<8x1xf32>
    %234 = vector.broadcast %233 : vector<8x1xf32> to vector<8x8xf32>
    %235 = arith.subf %231, %234 : vector<8x8xf32>
    %236 = math.exp %235 : vector<8x8xf32>
    %cst_78 = arith.constant dense<0.000000e+00> : vector<8xf32>
    %237 = vector.multi_reduction <add>, %236, %cst_78 [1] : vector<8x8xf32> to vector<8xf32>
    %238 = vector.shape_cast %237 : vector<8xf32> to vector<8x1xf32>
    %239 = vector.broadcast %238 : vector<8x1xf32> to vector<8x8xf32>
    %240 = arith.divf %236, %239 : vector<8x8xf32>
    %241 = arith.truncf %240 : vector<8x8xf32> to vector<8x8xbf16>
    %242 = arith.truncf %230 : vector<8x32xf32> to vector<8x32xbf16>
    %cst_79 = arith.constant dense<0.000000e+00> : vector<8x32xf32>
    %243 = tpu.matmul %241, %242, %cst_79 {dimension_numbers = #tpu.dot_dimension_numbers<[1], [0], [0], [1], [0, 0, 1, 1], [], []>} : vector<8x8xbf16>, vector<8x32xbf16>, vector<8x32xf32> -> vector<8x32xf32>
    %244 = arith.truncf %243 : vector<8x32xf32> to vector<8x32xbf16>
    %245 = vector.extract_strided_slice %19 {offsets = [64, 0], sizes = [32, 256], strides = [1, 1]} : vector<256x256xbf16> to vector<32x256xbf16>
    %cst_80 = arith.constant dense<0.000000e+00> : vector<8x256xf32>
    %246 = tpu.matmul %244, %245, %cst_80 {dimension_numbers = #tpu.dot_dimension_numbers<[1], [0], [0], [1], [0, 0, 1, 1], [], []>} : vector<8x32xbf16>, vector<32x256xbf16>, vector<8x256xf32> -> vector<8x256xf32>
    %247 = arith.addf %227, %246 : vector<8x256xf32>
    %248 = vector.extract_strided_slice %11 {offsets = [8, 96], sizes = [8, 32], strides = [1, 1]} : vector<16x256xf32> to vector<8x32xf32>
    %249 = vector.extract_strided_slice %14 {offsets = [8, 96], sizes = [8, 32], strides = [1, 1]} : vector<16x256xf32> to vector<8x32xf32>
    %250 = vector.extract_strided_slice %17 {offsets = [8, 96], sizes = [8, 32], strides = [1, 1]} : vector<16x256xf32> to vector<8x32xf32>
    %cst_81 = arith.constant dense<0.000000e+00> : vector<8x8xf32>
    %251 = tpu.matmul %248, %249, %cst_81 {dimension_numbers = #tpu.dot_dimension_numbers<[1], [1], [0], [0], [0, 0, 1, 0], [], []>} : vector<8x32xf32>, vector<8x32xf32>, vector<8x8xf32> -> vector<8x8xf32>
    %cst_82 = arith.constant dense<0xFF800000> : vector<8xf32>
    %252 = vector.multi_reduction <maximumf>, %251, %cst_82 [1] : vector<8x8xf32> to vector<8xf32>
    %253 = vector.shape_cast %252 : vector<8xf32> to vector<8x1xf32>
    %254 = vector.broadcast %253 : vector<8x1xf32> to vector<8x8xf32>
    %255 = arith.subf %251, %254 : vector<8x8xf32>
    %256 = math.exp %255 : vector<8x8xf32>
    %cst_83 = arith.constant dense<0.000000e+00> : vector<8xf32>
    %257 = vector.multi_reduction <add>, %256, %cst_83 [1] : vector<8x8xf32> to vector<8xf32>
    %258 = vector.shape_cast %257 : vector<8xf32> to vector<8x1xf32>
    %259 = vector.broadcast %258 : vector<8x1xf32> to vector<8x8xf32>
    %260 = arith.divf %256, %259 : vector<8x8xf32>
    %261 = arith.truncf %260 : vector<8x8xf32> to vector<8x8xbf16>
    %262 = arith.truncf %250 : vector<8x32xf32> to vector<8x32xbf16>
    %cst_84 = arith.constant dense<0.000000e+00> : vector<8x32xf32>
    %263 = tpu.matmul %261, %262, %cst_84 {dimension_numbers = #tpu.dot_dimension_numbers<[1], [0], [0], [1], [0, 0, 1, 1], [], []>} : vector<8x8xbf16>, vector<8x32xbf16>, vector<8x32xf32> -> vector<8x32xf32>
    %264 = arith.truncf %263 : vector<8x32xf32> to vector<8x32xbf16>
    %265 = vector.extract_strided_slice %19 {offsets = [96, 0], sizes = [32, 256], strides = [1, 1]} : vector<256x256xbf16> to vector<32x256xbf16>
    %cst_85 = arith.constant dense<0.000000e+00> : vector<8x256xf32>
    %266 = tpu.matmul %264, %265, %cst_85 {dimension_numbers = #tpu.dot_dimension_numbers<[1], [0], [0], [1], [0, 0, 1, 1], [], []>} : vector<8x32xbf16>, vector<32x256xbf16>, vector<8x256xf32> -> vector<8x256xf32>
    %267 = arith.addf %247, %266 : vector<8x256xf32>
    %268 = vector.extract_strided_slice %11 {offsets = [8, 128], sizes = [8, 32], strides = [1, 1]} : vector<16x256xf32> to vector<8x32xf32>
    %269 = vector.extract_strided_slice %14 {offsets = [8, 128], sizes = [8, 32], strides = [1, 1]} : vector<16x256xf32> to vector<8x32xf32>
    %270 = vector.extract_strided_slice %17 {offsets = [8, 128], sizes = [8, 32], strides = [1, 1]} : vector<16x256xf32> to vector<8x32xf32>
    %cst_86 = arith.constant dense<0.000000e+00> : vector<8x8xf32>
    %271 = tpu.matmul %268, %269, %cst_86 {dimension_numbers = #tpu.dot_dimension_numbers<[1], [1], [0], [0], [0, 0, 1, 0], [], []>} : vector<8x32xf32>, vector<8x32xf32>, vector<8x8xf32> -> vector<8x8xf32>
    %cst_87 = arith.constant dense<0xFF800000> : vector<8xf32>
    %272 = vector.multi_reduction <maximumf>, %271, %cst_87 [1] : vector<8x8xf32> to vector<8xf32>
    %273 = vector.shape_cast %272 : vector<8xf32> to vector<8x1xf32>
    %274 = vector.broadcast %273 : vector<8x1xf32> to vector<8x8xf32>
    %275 = arith.subf %271, %274 : vector<8x8xf32>
    %276 = math.exp %275 : vector<8x8xf32>
    %cst_88 = arith.constant dense<0.000000e+00> : vector<8xf32>
    %277 = vector.multi_reduction <add>, %276, %cst_88 [1] : vector<8x8xf32> to vector<8xf32>
    %278 = vector.shape_cast %277 : vector<8xf32> to vector<8x1xf32>
    %279 = vector.broadcast %278 : vector<8x1xf32> to vector<8x8xf32>
    %280 = arith.divf %276, %279 : vector<8x8xf32>
    %281 = arith.truncf %280 : vector<8x8xf32> to vector<8x8xbf16>
    %282 = arith.truncf %270 : vector<8x32xf32> to vector<8x32xbf16>
    %cst_89 = arith.constant dense<0.000000e+00> : vector<8x32xf32>
    %283 = tpu.matmul %281, %282, %cst_89 {dimension_numbers = #tpu.dot_dimension_numbers<[1], [0], [0], [1], [0, 0, 1, 1], [], []>} : vector<8x8xbf16>, vector<8x32xbf16>, vector<8x32xf32> -> vector<8x32xf32>
    %284 = arith.truncf %283 : vector<8x32xf32> to vector<8x32xbf16>
    %285 = vector.extract_strided_slice %19 {offsets = [128, 0], sizes = [32, 256], strides = [1, 1]} : vector<256x256xbf16> to vector<32x256xbf16>
    %cst_90 = arith.constant dense<0.000000e+00> : vector<8x256xf32>
    %286 = tpu.matmul %284, %285, %cst_90 {dimension_numbers = #tpu.dot_dimension_numbers<[1], [0], [0], [1], [0, 0, 1, 1], [], []>} : vector<8x32xbf16>, vector<32x256xbf16>, vector<8x256xf32> -> vector<8x256xf32>
    %287 = arith.addf %267, %286 : vector<8x256xf32>
    %288 = vector.extract_strided_slice %11 {offsets = [8, 160], sizes = [8, 32], strides = [1, 1]} : vector<16x256xf32> to vector<8x32xf32>
    %289 = vector.extract_strided_slice %14 {offsets = [8, 160], sizes = [8, 32], strides = [1, 1]} : vector<16x256xf32> to vector<8x32xf32>
    %290 = vector.extract_strided_slice %17 {offsets = [8, 160], sizes = [8, 32], strides = [1, 1]} : vector<16x256xf32> to vector<8x32xf32>
    %cst_91 = arith.constant dense<0.000000e+00> : vector<8x8xf32>
    %291 = tpu.matmul %288, %289, %cst_91 {dimension_numbers = #tpu.dot_dimension_numbers<[1], [1], [0], [0], [0, 0, 1, 0], [], []>} : vector<8x32xf32>, vector<8x32xf32>, vector<8x8xf32> -> vector<8x8xf32>
    %cst_92 = arith.constant dense<0xFF800000> : vector<8xf32>
    %292 = vector.multi_reduction <maximumf>, %291, %cst_92 [1] : vector<8x8xf32> to vector<8xf32>
    %293 = vector.shape_cast %292 : vector<8xf32> to vector<8x1xf32>
    %294 = vector.broadcast %293 : vector<8x1xf32> to vector<8x8xf32>
    %295 = arith.subf %291, %294 : vector<8x8xf32>
    %296 = math.exp %295 : vector<8x8xf32>
    %cst_93 = arith.constant dense<0.000000e+00> : vector<8xf32>
    %297 = vector.multi_reduction <add>, %296, %cst_93 [1] : vector<8x8xf32> to vector<8xf32>
    %298 = vector.shape_cast %297 : vector<8xf32> to vector<8x1xf32>
    %299 = vector.broadcast %298 : vector<8x1xf32> to vector<8x8xf32>
    %300 = arith.divf %296, %299 : vector<8x8xf32>
    %301 = arith.truncf %300 : vector<8x8xf32> to vector<8x8xbf16>
    %302 = arith.truncf %290 : vector<8x32xf32> to vector<8x32xbf16>
    %cst_94 = arith.constant dense<0.000000e+00> : vector<8x32xf32>
    %303 = tpu.matmul %301, %302, %cst_94 {dimension_numbers = #tpu.dot_dimension_numbers<[1], [0], [0], [1], [0, 0, 1, 1], [], []>} : vector<8x8xbf16>, vector<8x32xbf16>, vector<8x32xf32> -> vector<8x32xf32>
    %304 = arith.truncf %303 : vector<8x32xf32> to vector<8x32xbf16>
    %305 = vector.extract_strided_slice %19 {offsets = [160, 0], sizes = [32, 256], strides = [1, 1]} : vector<256x256xbf16> to vector<32x256xbf16>
    %cst_95 = arith.constant dense<0.000000e+00> : vector<8x256xf32>
    %306 = tpu.matmul %304, %305, %cst_95 {dimension_numbers = #tpu.dot_dimension_numbers<[1], [0], [0], [1], [0, 0, 1, 1], [], []>} : vector<8x32xbf16>, vector<32x256xbf16>, vector<8x256xf32> -> vector<8x256xf32>
    %307 = arith.addf %287, %306 : vector<8x256xf32>
    %308 = vector.extract_strided_slice %11 {offsets = [8, 192], sizes = [8, 32], strides = [1, 1]} : vector<16x256xf32> to vector<8x32xf32>
    %309 = vector.extract_strided_slice %14 {offsets = [8, 192], sizes = [8, 32], strides = [1, 1]} : vector<16x256xf32> to vector<8x32xf32>
    %310 = vector.extract_strided_slice %17 {offsets = [8, 192], sizes = [8, 32], strides = [1, 1]} : vector<16x256xf32> to vector<8x32xf32>
    %cst_96 = arith.constant dense<0.000000e+00> : vector<8x8xf32>
    %311 = tpu.matmul %308, %309, %cst_96 {dimension_numbers = #tpu.dot_dimension_numbers<[1], [1], [0], [0], [0, 0, 1, 0], [], []>} : vector<8x32xf32>, vector<8x32xf32>, vector<8x8xf32> -> vector<8x8xf32>
    %cst_97 = arith.constant dense<0xFF800000> : vector<8xf32>
    %312 = vector.multi_reduction <maximumf>, %311, %cst_97 [1] : vector<8x8xf32> to vector<8xf32>
    %313 = vector.shape_cast %312 : vector<8xf32> to vector<8x1xf32>
    %314 = vector.broadcast %313 : vector<8x1xf32> to vector<8x8xf32>
    %315 = arith.subf %311, %314 : vector<8x8xf32>
    %316 = math.exp %315 : vector<8x8xf32>
    %cst_98 = arith.constant dense<0.000000e+00> : vector<8xf32>
    %317 = vector.multi_reduction <add>, %316, %cst_98 [1] : vector<8x8xf32> to vector<8xf32>
    %318 = vector.shape_cast %317 : vector<8xf32> to vector<8x1xf32>
    %319 = vector.broadcast %318 : vector<8x1xf32> to vector<8x8xf32>
    %320 = arith.divf %316, %319 : vector<8x8xf32>
    %321 = arith.truncf %320 : vector<8x8xf32> to vector<8x8xbf16>
    %322 = arith.truncf %310 : vector<8x32xf32> to vector<8x32xbf16>
    %cst_99 = arith.constant dense<0.000000e+00> : vector<8x32xf32>
    %323 = tpu.matmul %321, %322, %cst_99 {dimension_numbers = #tpu.dot_dimension_numbers<[1], [0], [0], [1], [0, 0, 1, 1], [], []>} : vector<8x8xbf16>, vector<8x32xbf16>, vector<8x32xf32> -> vector<8x32xf32>
    %324 = arith.truncf %323 : vector<8x32xf32> to vector<8x32xbf16>
    %325 = vector.extract_strided_slice %19 {offsets = [192, 0], sizes = [32, 256], strides = [1, 1]} : vector<256x256xbf16> to vector<32x256xbf16>
    %cst_100 = arith.constant dense<0.000000e+00> : vector<8x256xf32>
    %326 = tpu.matmul %324, %325, %cst_100 {dimension_numbers = #tpu.dot_dimension_numbers<[1], [0], [0], [1], [0, 0, 1, 1], [], []>} : vector<8x32xbf16>, vector<32x256xbf16>, vector<8x256xf32> -> vector<8x256xf32>
    %327 = arith.addf %307, %326 : vector<8x256xf32>
    %328 = vector.extract_strided_slice %11 {offsets = [8, 224], sizes = [8, 32], strides = [1, 1]} : vector<16x256xf32> to vector<8x32xf32>
    %329 = vector.extract_strided_slice %14 {offsets = [8, 224], sizes = [8, 32], strides = [1, 1]} : vector<16x256xf32> to vector<8x32xf32>
    %330 = vector.extract_strided_slice %17 {offsets = [8, 224], sizes = [8, 32], strides = [1, 1]} : vector<16x256xf32> to vector<8x32xf32>
    %cst_101 = arith.constant dense<0.000000e+00> : vector<8x8xf32>
    %331 = tpu.matmul %328, %329, %cst_101 {dimension_numbers = #tpu.dot_dimension_numbers<[1], [1], [0], [0], [0, 0, 1, 0], [], []>} : vector<8x32xf32>, vector<8x32xf32>, vector<8x8xf32> -> vector<8x8xf32>
    %cst_102 = arith.constant dense<0xFF800000> : vector<8xf32>
    %332 = vector.multi_reduction <maximumf>, %331, %cst_102 [1] : vector<8x8xf32> to vector<8xf32>
    %333 = vector.shape_cast %332 : vector<8xf32> to vector<8x1xf32>
    %334 = vector.broadcast %333 : vector<8x1xf32> to vector<8x8xf32>
    %335 = arith.subf %331, %334 : vector<8x8xf32>
    %336 = math.exp %335 : vector<8x8xf32>
    %cst_103 = arith.constant dense<0.000000e+00> : vector<8xf32>
    %337 = vector.multi_reduction <add>, %336, %cst_103 [1] : vector<8x8xf32> to vector<8xf32>
    %338 = vector.shape_cast %337 : vector<8xf32> to vector<8x1xf32>
    %339 = vector.broadcast %338 : vector<8x1xf32> to vector<8x8xf32>
    %340 = arith.divf %336, %339 : vector<8x8xf32>
    %341 = arith.truncf %340 : vector<8x8xf32> to vector<8x8xbf16>
    %342 = arith.truncf %330 : vector<8x32xf32> to vector<8x32xbf16>
    %cst_104 = arith.constant dense<0.000000e+00> : vector<8x32xf32>
    %343 = tpu.matmul %341, %342, %cst_104 {dimension_numbers = #tpu.dot_dimension_numbers<[1], [0], [0], [1], [0, 0, 1, 1], [], []>} : vector<8x8xbf16>, vector<8x32xbf16>, vector<8x32xf32> -> vector<8x32xf32>
    %344 = arith.truncf %343 : vector<8x32xf32> to vector<8x32xbf16>
    %345 = vector.extract_strided_slice %19 {offsets = [224, 0], sizes = [32, 256], strides = [1, 1]} : vector<256x256xbf16> to vector<32x256xbf16>
    %cst_105 = arith.constant dense<0.000000e+00> : vector<8x256xf32>
    %346 = tpu.matmul %344, %345, %cst_105 {dimension_numbers = #tpu.dot_dimension_numbers<[1], [0], [0], [1], [0, 0, 1, 1], [], []>} : vector<8x32xbf16>, vector<32x256xbf16>, vector<8x256xf32> -> vector<8x256xf32>
    %347 = arith.addf %327, %346 : vector<8x256xf32>
    %348 = vector.broadcast %20 : vector<1x256xf32> to vector<8x256xf32>
    %349 = arith.addf %347, %348 : vector<8x256xf32>
    %c1_106 = arith.constant 1 : index
    %c0_107 = arith.constant 0 : index
    %c0_108 = arith.constant 0 : index
    %350 = vector.load %arg6[%c1_106, %c0_107, %c0_108] : memref<2x8x256xf32, #tpu.memory_space<vmem>>, vector<1x8x256xf32>
    %351 = vector.shape_cast %350 : vector<1x8x256xf32> to vector<8x256xf32>
    %352 = vector.shape_cast %349 : vector<8x256xf32> to vector<1x8x256xf32>
    tpu.vector_store %arg6[%c1_106, %c0_107, %c0_108], %352 {strides = array<i32>} : memref<2x8x256xf32, #tpu.memory_space<vmem>>, vector<1x8x256xf32>,
    return
  }
  func.func @transform_0(%arg0: i32) -> (i32, i32, i32) {
    %c0_i32 = arith.constant 0 : i32
    %c0_i32_0 = arith.constant 0 : i32
    %c0_i32_1 = arith.constant 0 : i32
    return %arg0, %c0_i32, %c0_i32_0 : i32, i32, i32
  }
  func.func @transform_1(%arg0: i32) -> (i32, i32, i32) {
    %c0_i32 = arith.constant 0 : i32
    %c0_i32_0 = arith.constant 0 : i32
    %c0_i32_1 = arith.constant 0 : i32
    return %arg0, %c0_i32, %c0_i32_0 : i32, i32, i32
  }
  func.func @transform_2(%arg0: i32) -> (i32, i32, i32) {
    %c0_i32 = arith.constant 0 : i32
    %c0_i32_0 = arith.constant 0 : i32
    %c0_i32_1 = arith.constant 0 : i32
    return %arg0, %c0_i32, %c0_i32_0 : i32, i32, i32
  }
  func.func @transform_3(%arg0: i32) -> (i32, i32, i32) {
    %c0_i32 = arith.constant 0 : i32
    %c0_i32_0 = arith.constant 0 : i32
    %c0_i32_1 = arith.constant 0 : i32
    %c0_i32_2 = arith.constant 0 : i32
    return %c0_i32, %c0_i32_0, %c0_i32_1 : i32, i32, i32
  }
  func.func @transform_4(%arg0: i32) -> (i32, i32) {
    %c0_i32 = arith.constant 0 : i32
    %c0_i32_0 = arith.constant 0 : i32
    %c0_i32_1 = arith.constant 0 : i32
    return %c0_i32, %c0_i32_0 : i32, i32
  }
  func.func @transform_5(%arg0: i32) -> (i32, i32, i32) {
    %c0_i32 = arith.constant 0 : i32
    %c0_i32_0 = arith.constant 0 : i32
    %c0_i32_1 = arith.constant 0 : i32
    return %arg0, %c0_i32, %c0_i32_0 : i32, i32, i32
  }
}

</mosaic_0001>

<bundles_post_ra>
// kernel: tpu_custom_call.1
= control target key start
LH: loop header
LB: loop body
LE: loop exit
PB: predicated region body
PF: predicated region fallthrough
CT: control target
= control target key end

     0   :  { %10 = vsyncpa [#allocation3], 0  ;;  %s5433_s0 = inlined_call_operand.hbm [shape: f32[2,8,256], index: 0, kind: input, shape index: {}]   ;;  %s5434_s1 = inlined_call_operand.hbm [shape: f32[2,8,256], index: 1, kind: input, shape index: {}]   ;;  %s5435_s2 = inlined_call_operand.hbm [shape: f32[2,8,256], index: 2, kind: input, shape index: {}]   ;;  %s5436_s3 = inlined_call_operand.hbm [shape: bf16[4,256,256], index: 3, kind: input, shape index: {}]   ;;  %s5437_s4 = inlined_call_operand.vmem [shape: f32[1,256], index: 4, kind: input, shape index: {}]   ;;  %s5438_s5 = inlined_call_operand.hbm [shape: f32[2,8,256], index: 5, kind: output, shape index: {}]  }
   0x1   :  { %11 = vsyncpa [#allocation6], 0 }
   0x2   :  { %12 = vsyncpa [#allocation9], 0 }
   0x3   :  { %13 = vsyncpa [#allocation4], 0  ;;  %s4803_s18 = smov [#allocation5]   ;;  %s4804_s20 = smov [#allocation2]  }
   0x4   :  { %s31_s19 = sshll.u32 %s4803_s18, 4  ;;  %s19_s21 = sshll.u32 %s4804_s20, 4  ;;  %s32_s19 = int_to_ptr.vmem [resolvable:$true] %s31_s19  ;;  %s4848_s21 = int_to_ptr.vmem [resolvable:$true] %s19_s21 }
   0x5   :  { %s4685_s24 = scalar_lea.hbm %s5434_s1, 512 }
   0x6   :  { %p4686_p0 = scmp.ne.s32.totalorder %s5434_s1, %s4685_s24  ;;  %p4689_p1 = scmp.lt.u32.totalorder %s4685_s24, %s5434_s1 }
   0x8   :  { %p4691_p2 = pnand %p4689_p1, %p4686_p0 }
   0xa   :  { %4694 = shalt.err (!%p4691_p2)
}
   0xb   :  { %s4695_s29 = scalar_lea.vmem %s32_s19, 512  ;;  %p4700_p4 = scmp.lt.s32.totalorder %s32_s19, %s32_s19 }
   0xc   :  { %p4696_p3 = scmp.ne.s32.totalorder %s32_s19, %s4695_s29  ;;  %p4701_p5 = scmp.lt.s32.totalorder %s4695_s29, %s4695_s29 }
   0xe   :  { %p4702_p6 = por %p4701_p5, %p4700_p4 }
  0x10   :  { %p4703_p7 = pnand %p4702_p6, %p4696_p3 }
  0x12   :  { %4706 = shalt.err (!%p4703_p7)
}
  0x13   :  { %s4805_s30 = smov 256   ;;  %s4806_s6 = smov 16  }
  0x14   :  { %37 = dma.hbm_to_vmem [thread:$0]  %s5434_s1, 512, %s32_s19, [#allocation6], %s4805_s30, %s4805_s30, %s4806_s6  }
  0x15   :  { %s4707_s11 = scalar_lea.hbm %s5433_s0, 512 }
  0x16   :  { %p4708_p8 = scmp.ne.s32.totalorder %s5433_s0, %s4707_s11  ;;  %p4711_p9 = scmp.lt.u32.totalorder %s4707_s11, %s5433_s0 }
  0x18   :  { %p4713_p10 = pnand %p4711_p9, %p4708_p8 }
  0x1a   :  { %4716 = shalt.err (!%p4713_p10)
}
  0x1b   :  { %s4717_s16 = scalar_lea.vmem %s4848_s21, 512  ;;  %p4722_p12 = scmp.lt.s32.totalorder %s4848_s21, %s4848_s21 }
  0x1c   :  { %p4718_p11 = scmp.ne.s32.totalorder %s4848_s21, %s4717_s16  ;;  %p4723_p13 = scmp.lt.s32.totalorder %s4717_s16, %s4717_s16 }
  0x1e   :  { %p4724_p0 = por %p4723_p13, %p4722_p12 }
  0x20   :  { %p4725_p1 = pnand %p4724_p0, %p4718_p11 }
  0x22   :  { %4728 = shalt.err (!%p4725_p1)
}
  0x23   :  { %25 = dma.hbm_to_vmem [thread:$0]  %s5433_s0, 512, %s4848_s21, [#allocation3], %s4805_s30, %s4805_s30, %s4806_s6  }
  0x24   :  { %s4807_s18 = smov [#allocation7]   ;;  %s4808_s20 = smov [#allocation8]  }
  0x25   :  { %s43_s19 = sshll.u32 %s4807_s18, 4  ;;  %s55_s22 = sshll.u32 %s4808_s20, 4  ;;  %s44_s19 = int_to_ptr.vmem [resolvable:$true] %s43_s19  ;;  %s4885_s22 = int_to_ptr.vmem [resolvable:$true] %s55_s22 }
  0x26   :  { %s4729_s25 = scalar_lea.hbm %s5435_s2, 512 }
  0x27   :  { %p4730_p2 = scmp.ne.s32.totalorder %s5435_s2, %s4729_s25  ;;  %p4733_p3 = scmp.lt.u32.totalorder %s4729_s25, %s5435_s2 }
  0x29   :  { %p4735_p4 = pnand %p4733_p3, %p4730_p2 }
  0x2b   :  { %4738 = shalt.err (!%p4735_p4)
}
  0x2c   :  { %s4739_s0 = scalar_lea.vmem %s44_s19, 512  ;;  %p4744_p6 = scmp.lt.s32.totalorder %s44_s19, %s44_s19 }
  0x2d   :  { %p4740_p5 = scmp.ne.s32.totalorder %s44_s19, %s4739_s0  ;;  %p4745_p7 = scmp.lt.s32.totalorder %s4739_s0, %s4739_s0 }
  0x2f   :  { %p4746_p8 = por %p4745_p7, %p4744_p6 }
  0x31   :  { %p4747_p9 = pnand %p4746_p8, %p4740_p5 }
  0x33   :  { %4750 = shalt.err (!%p4747_p9)
}
  0x34   :  { %49 = dma.hbm_to_vmem [thread:$0]  %s5435_s2, 512, %s44_s19, [#allocation6], %s4805_s30, %s4805_s30, %s4806_s6  }
  0x35   :  { %s4751_s10 = scalar_lea.hbm %s5436_s3, 16384 }
  0x36   :  { %p4752_p10 = scmp.ne.s32.totalorder %s5436_s3, %s4751_s10  ;;  %p4755_p11 = scmp.lt.u32.totalorder %s4751_s10, %s5436_s3 }
  0x38   :  { %p4757_p12 = pnand %p4755_p11, %p4752_p10 }
  0x3a   :  { %4760 = shalt.err (!%p4757_p12)
}
  0x3b   :  { %s4761_s15 = scalar_lea.vmem %s4885_s22, 16384  ;;  %p4766_p0 = scmp.lt.s32.totalorder %s4885_s22, %s4885_s22 }
  0x3c   :  { %p4762_p13 = scmp.ne.s32.totalorder %s4885_s22, %s4761_s15  ;;  %p4767_p1 = scmp.lt.s32.totalorder %s4761_s15, %s4761_s15 }
  0x3e   :  { %p4768_p2 = por %p4767_p1, %p4766_p0 }
  0x40   :  { %p4769_p3 = pnand %p4768_p2, %p4762_p13 }
  0x42   :  { %4772 = shalt.err (!%p4769_p3)
}
  0x43   :  { %s4809_s2 = smov 128   ;;  %s4810_s16 = smov 8  }
  0x44   :  { %61 = dma.hbm_to_vmem [thread:$0]  %s5436_s3, 16384, %s4885_s22, [#allocation9], %s4809_s2, %s4809_s2, %s4810_s16  }
  0x45   :  { %4795 = dma.done.wait [#allocation3], 512  }
  0x46   :  { %4796 = vsyncadd [#allocation3], 4294966784 }
  0x47   :  { %4797 = dma.done.wait [#allocation6], 1024  }
  0x48   :  { %4798 = vsyncadd [#allocation6], 4294966272 }
  0x49   :  { %4799 = dma.done.wait [#allocation9], 16384  }
  0x4a   :  { %4800 = vsyncadd [#allocation9], 4294950912  ;;  %v4429_v0 = vld [vmem:[#allocation8 + $0x4] ss:$8 sps:$4 sm:$0xff]   ;;  %v4433_v2 = vld [vmem:[#allocation8] ss:$8 sps:$4 sm:$0xff]  }
  0x4b   :  { %v4431_v1 = vld [vmem:[#allocation8 + $0x104] ss:$8 sps:$4 sm:$0xff]   ;;  %287 = vmatprep.subr.bf16.mxu0 %v4429_v0  ;;  %v4434_v3 = vld [vmem:[#allocation8 + $0x100] ss:$8 sps:$4 sm:$0xff]   ;;  %v4435_v4 = vld [vmem:[#allocation8 + $0x14] ss:$8 sps:$4 sm:$0xff]  }
  0x4c   :  { %523 = vmatprep.subr.bf16.mxu1 %v4431_v1  ;;  %288 = vmatpush1.bf16.msra.mxu0 %v4433_v2  ;;  %v4437_v5 = vld [vmem:[#allocation8 + $0x114] ss:$8 sps:$4 sm:$0xff]   ;;  %v4439_v6 = vld [vmem:[#allocation8 + $0x10] ss:$8 sps:$4 sm:$0xff]   ;;  %v4441_v8 = vld [vmem:[#allocation8 + $0x24] ss:$8 sps:$4 sm:$0xff]  }
  0x4d   :  { %524 = vmatpush1.bf16.msra.mxu1 %v4434_v3  ;;  %289 = vmatprep.subr.bf16.mxu0 %v4435_v4  ;;  %v4440_v7 = vld [vmem:[#allocation8 + $0x110] ss:$8 sps:$4 sm:$0xff]   ;;  %v4443_v9 = vld [vmem:[#allocation8 + $0x124] ss:$8 sps:$4 sm:$0xff]   ;;  %v4445_v10 = vld [vmem:[#allocation8 + $0x20] ss:$8 sps:$4 sm:$0xff]  }
  0x4e   :  { %525 = vmatprep.subr.bf16.mxu1 %v4437_v5  ;;  %v4446_v11 = vld [vmem:[#allocation8 + $0x120] ss:$8 sps:$4 sm:$0xff]   ;;  %v4447_v12 = vld [vmem:[#allocation8 + $0x34] ss:$8 sps:$4 sm:$0xff]   ;;  %v4451_v14 = vld [vmem:[#allocation8 + $0x30] ss:$8 sps:$4 sm:$0xff]  }
  0x4f   :  { %v4449_v13 = vld [vmem:[#allocation8 + $0x134] ss:$8 sps:$4 sm:$0xff]   ;;  %v4452_v15 = vld [vmem:[#allocation8 + $0x130] ss:$8 sps:$4 sm:$0xff]   ;;  %v4453_v16 = vld [vmem:[#allocation8 + $0x44] ss:$8 sps:$4 sm:$0xff]  }
  0x50   :  { %290 = vmatpush1.bf16.msra.mxu0 %v4439_v6  ;;  %v4455_v17 = vld [vmem:[#allocation8 + $0x144] ss:$8 sps:$4 sm:$0xff]   ;;  %v4457_v18 = vld [vmem:[#allocation8 + $0x40] ss:$8 sps:$4 sm:$0xff]   ;;  %v4459_v20 = vld [vmem:[#allocation8 + $0x54] ss:$8 sps:$4 sm:$0xff]  }
  0x51   :  { %526 = vmatpush1.bf16.msra.mxu1 %v4440_v7  ;;  %291 = vmatprep.subr.bf16.mxu0 %v4441_v8  ;;  %v4458_v19 = vld [vmem:[#allocation8 + $0x140] ss:$8 sps:$4 sm:$0xff]   ;;  %v4461_v21 = vld [vmem:[#allocation8 + $0x154] ss:$8 sps:$4 sm:$0xff]   ;;  %v4463_v22 = vld [vmem:[#allocation8 + $0x50] ss:$8 sps:$4 sm:$0xff]  }
  0x52   :  { %527 = vmatprep.subr.bf16.mxu1 %v4443_v9  ;;  %v4464_v23 = vld [vmem:[#allocation8 + $0x150] ss:$8 sps:$4 sm:$0xff]   ;;  %v4465_v24 = vld [vmem:[#allocation8 + $0x64] ss:$8 sps:$4 sm:$0xff]   ;;  %v4469_v26 = vld [vmem:[#allocation8 + $0x60] ss:$8 sps:$4 sm:$0xff]  }
  0x53   :  { %v4467_v25 = vld [vmem:[#allocation8 + $0x164] ss:$8 sps:$4 sm:$0xff]   ;;  %v4470_v27 = vld [vmem:[#allocation8 + $0x160] ss:$8 sps:$4 sm:$0xff]   ;;  %v4471_v28 = vld [vmem:[#allocation8 + $0x74] ss:$8 sps:$4 sm:$0xff]  }
  0x54   :  { %292 = vmatpush1.bf16.msra.mxu0 %v4445_v10  ;;  %v4473_v29 = vld [vmem:[#allocation8 + $0x174] ss:$8 sps:$4 sm:$0xff]   ;;  %v4475_v30 = vld [vmem:[#allocation8 + $0x70] ss:$8 sps:$4 sm:$0xff]   ;;  %v4477_v32 = vld [vmem:[#allocation8 + $0x84] ss:$8 sps:$4 sm:$0xff]  }
  0x55   :  { %528 = vmatpush1.bf16.msra.mxu1 %v4446_v11  ;;  %293 = vmatprep.subr.bf16.mxu0 %v4447_v12  ;;  %v4476_v31 = vld [vmem:[#allocation8 + $0x170] ss:$8 sps:$4 sm:$0xff]   ;;  %v4479_v33 = vld [vmem:[#allocation8 + $0x184] ss:$8 sps:$4 sm:$0xff]   ;;  %v4481_v34 = vld [vmem:[#allocation8 + $0x80] ss:$8 sps:$4 sm:$0xff]  }
  0x56   :  { %529 = vmatprep.subr.bf16.mxu1 %v4449_v13  ;;  %v4482_v35 = vld [vmem:[#allocation8 + $0x180] ss:$8 sps:$4 sm:$0xff]   ;;  %v4483_v36 = vld [vmem:[#allocation8 + $0x94] ss:$8 sps:$4 sm:$0xff]   ;;  %v4487_v38 = vld [vmem:[#allocation8 + $0x90] ss:$8 sps:$4 sm:$0xff]  }
  0x57   :  { %v4485_v37 = vld [vmem:[#allocation8 + $0x194] ss:$8 sps:$4 sm:$0xff]   ;;  %v4488_v39 = vld [vmem:[#allocation8 + $0x190] ss:$8 sps:$4 sm:$0xff]   ;;  %v4489_v40 = vld [vmem:[#allocation8 + $0xa4] ss:$8 sps:$4 sm:$0xff]  }
  0x58   :  { %294 = vmatpush1.bf16.msra.mxu0 %v4451_v14  ;;  %v4491_v41 = vld [vmem:[#allocation8 + $0x1a4] ss:$8 sps:$4 sm:$0xff]   ;;  %v4493_v42 = vld [vmem:[#allocation8 + $0xa0] ss:$8 sps:$4 sm:$0xff]   ;;  %v4495_v44 = vld [vmem:[#allocation8 + $0xb4] ss:$8 sps:$4 sm:$0xff]  }
  0x59   :  { %530 = vmatpush1.bf16.msra.mxu1 %v4452_v15  ;;  %295 = vmatprep.subr.bf16.mxu0 %v4453_v16  ;;  %v4494_v43 = vld [vmem:[#allocation8 + $0x1a0] ss:$8 sps:$4 sm:$0xff]   ;;  %v4497_v45 = vld [vmem:[#allocation8 + $0x1b4] ss:$8 sps:$4 sm:$0xff]   ;;  %v4499_v50 = vld [vmem:[#allocation8 + $0xb0] ss:$8 sps:$4 sm:$0xff]  }
  0x5a   :  { %531 = vmatprep.subr.bf16.mxu1 %v4455_v17  ;;  %v78_v46 = vld [vmem:[#allocation2 + $0x8] sm:$0xff]  ;;  %v80_v47 = vld [vmem:[#allocation2 + $0x18] sm:$0xff]  ;;  %v77_v6 = vld [vmem:[#allocation2] sm:$0xff]  ;;  %vm4812_vm0 = vmmov 0   ;;  %vm836_vm1 = vcmask 261120   ;;  %s4813_s3 = smov 96  }
  0x5b   :  { %v84_v48 = vld [vmem:[#allocation5 + $0x8] sm:$0xff]  ;;  %v86_v49 = vld [vmem:[#allocation5 + $0x18] sm:$0xff]  ;;  %v82_v53 = vpack.c.bf16 %v80_v47, %v78_v46  ;;  %v79_v7 = vld [vmem:[#allocation2 + $0x10] sm:$0xff]  ;;  %vm913_vm2 = vcmask 64512   ;;  %vm930_vm3 = vcmask 1043456   ;;  %s4814_s18 = smov 64  }
  0x5c   :  { %296 = vmatpush1.bf16.msra.mxu0 %v4457_v18  ;;  %v4500_v51 = vld [vmem:[#allocation8 + $0x1b0] ss:$8 sps:$4 sm:$0xff]   ;;  %v4501_v52 = vld [vmem:[#allocation8 + $0xc4] ss:$8 sps:$4 sm:$0xff]   ;;  %v88_v54 = vpack.c.bf16 %v86_v49, %v84_v48  ;;  %v4505_v56 = vld [vmem:[#allocation8 + $0xc0] ss:$8 sps:$4 sm:$0xff]   ;;  %v81_v11 = vpack.c.bf16 %v79_v7, %v77_v6 }
  0x5d   :  { %532 = vmatpush1.bf16.msra.mxu1 %v4458_v19  ;;  %297 = vmatprep.subr.bf16.mxu0 %v4459_v20  ;;  %v4503_v55 = vld [vmem:[#allocation8 + $0x1c4] ss:$8 sps:$4 sm:$0xff]   ;;  %v4506_v57 = vld [vmem:[#allocation8 + $0x1c0] ss:$8 sps:$4 sm:$0xff]   ;;  %v4507_v58 = vld [vmem:[#allocation8 + $0xd4] ss:$8 sps:$4 sm:$0xff]  }
  0x5e   :  { %533 = vmatprep.subr.bf16.mxu1 %v4461_v21  ;;  %319 = vmatprep.mubr.bf16.mxu0 %v82_v53  ;;  %v4509_v59 = vld [vmem:[#allocation8 + $0x1d4] ss:$8 sps:$4 sm:$0xff]   ;;  %v4511_v60 = vld [vmem:[#allocation8 + $0xd0] ss:$8 sps:$4 sm:$0xff]   ;;  %v4513_v62 = vld [vmem:[#allocation8 + $0xe4] ss:$8 sps:$4 sm:$0xff]  }
  0x5f   :  { %555 = vmatprep.mubr.bf16.mxu1 %v88_v54  ;;  %v4512_v61 = vld [vmem:[#allocation8 + $0x1d0] ss:$8 sps:$4 sm:$0xff]   ;;  %v4515_v63 = vld [vmem:[#allocation8 + $0x1e4] ss:$8 sps:$4 sm:$0xff]   ;;  %v4517_v0 = vld [vmem:[#allocation8 + $0xe0] ss:$8 sps:$4 sm:$0xff]  }
  0x60   :  { %298 = vmatpush1.bf16.msra.mxu0 %v4463_v22  ;;  %v4518_v1 = vld [vmem:[#allocation8 + $0x1e0] ss:$8 sps:$4 sm:$0xff]   ;;  %v4519_v2 = vld [vmem:[#allocation8 + $0xf4] ss:$8 sps:$4 sm:$0xff]   ;;  %v4523_v4 = vld [vmem:[#allocation8 + $0xf0] ss:$8 sps:$4 sm:$0xff]  }
  0x61   :  { %534 = vmatpush1.bf16.msra.mxu1 %v4464_v23  ;;  %299 = vmatprep.subr.bf16.mxu0 %v4465_v24  ;;  %v4521_v3 = vld [vmem:[#allocation8 + $0x1f4] ss:$8 sps:$4 sm:$0xff]   ;;  %v4524_v5 = vld [vmem:[#allocation8 + $0x1f0] ss:$8 sps:$4 sm:$0xff]   ;;  %v83_v8 = vld [vmem:[#allocation5] sm:$0xff]  ;;  %s4816_s19 = smov 32  }
  0x62   :  { %535 = vmatprep.subr.bf16.mxu1 %v4467_v25  ;;  %v85_v9 = vld [vmem:[#allocation5 + $0x10] sm:$0xff]  ;;  %v4527_v10 = vld [vmem:[#allocation8 + $0x204] ss:$8 sps:$4 sm:$0xff]   ;;  %v4525_v13 = vld [vmem:[#allocation8 + $0x200] ss:$8 sps:$4 sm:$0xff]  }
  0x63   :  { %v87_v12 = vpack.c.bf16 %v85_v9, %v83_v8  ;;  %v4530_v14 = vld [vmem:[#allocation8 + $0x214] ss:$8 sps:$4 sm:$0xff]   ;;  %v90_v15 = vld [vmem:[#allocation7 + $0x8] sm:$0xff]  ;;  %v4528_v16 = vld [vmem:[#allocation8 + $0x210] ss:$8 sps:$4 sm:$0xff]  }
  0x64   :  { %300 = vmatpush1.bf16.msra.mxu0 %v4469_v26  ;;  %v4533_v17 = vld [vmem:[#allocation8 + $0x224] ss:$8 sps:$4 sm:$0xff]   ;;  %v92_v18 = vld [vmem:[#allocation7 + $0x18] sm:$0xff]  ;;  %v4531_v20 = vld [vmem:[#allocation8 + $0x220] ss:$8 sps:$4 sm:$0xff]  }
  0x65   :  { %536 = vmatpush1.bf16.msra.mxu1 %v4470_v27  ;;  %301 = vmatprep.subr.bf16.mxu0 %v4471_v28  ;;  %v94_v19 = vpack.c.bf16 %v92_v18, %v90_v15  ;;  %v4536_v21 = vld [vmem:[#allocation8 + $0x234] ss:$8 sps:$4 sm:$0xff]   ;;  %v4534_v22 = vld [vmem:[#allocation8 + $0x230] ss:$8 sps:$4 sm:$0xff]   ;;  %v4539_v23 = vld [vmem:[#allocation8 + $0x244] ss:$8 sps:$4 sm:$0xff]  }
  0x66   :  { %537 = vmatprep.subr.bf16.mxu1 %v4473_v29  ;;  %v4537_v24 = vld [vmem:[#allocation8 + $0x240] ss:$8 sps:$4 sm:$0xff]   ;;  %v4542_v25 = vld [vmem:[#allocation8 + $0x254] ss:$8 sps:$4 sm:$0xff]   ;;  %v4540_v26 = vld [vmem:[#allocation8 + $0x250] ss:$8 sps:$4 sm:$0xff]  }
  0x67   :  { %v4545_v27 = vld [vmem:[#allocation8 + $0x264] ss:$8 sps:$4 sm:$0xff]   ;;  %v4543_v28 = vld [vmem:[#allocation8 + $0x260] ss:$8 sps:$4 sm:$0xff]   ;;  %v4548_v29 = vld [vmem:[#allocation8 + $0x274] ss:$8 sps:$4 sm:$0xff]  }
  0x68   :  { %302 = vmatpush1.bf16.msra.mxu0 %v4475_v30  ;;  %v4546_v30 = vld [vmem:[#allocation8 + $0x270] ss:$8 sps:$4 sm:$0xff]   ;;  %v89_v47 = vld [vmem:[#allocation7] sm:$0xff] }
  0x69   :  { %538 = vmatpush1.bf16.msra.mxu1 %v4476_v31  ;;  %303 = vmatprep.subr.bf16.mxu0 %v4477_v32  ;;  %v4551_v31 = vld [vmem:[#allocation8 + $0x284] ss:$8 sps:$4 sm:$0xff]   ;;  %v4549_v32 = vld [vmem:[#allocation8 + $0x280] ss:$8 sps:$4 sm:$0xff]   ;;  %v4570_v46 = vld [vmem:[#allocation8 + $0x2f0] ss:$8 sps:$4 sm:$0xff]  }
  0x6a   :  { %539 = vmatprep.subr.bf16.mxu1 %v4479_v33  ;;  %v4554_v33 = vld [vmem:[#allocation8 + $0x294] ss:$8 sps:$4 sm:$0xff]  }
  0x6b   :  { %v91_v48 = vld [vmem:[#allocation7 + $0x10] sm:$0xff] }
  0x6c   :  { %304 = vmatpush1.bf16.msra.mxu0 %v4481_v34  ;;  %v4552_v34 = vld [vmem:[#allocation8 + $0x290] ss:$8 sps:$4 sm:$0xff]   ;;  %v93_v49 = vpack.c.bf16 %v91_v48, %v89_v47  ;;  %v5013_v47 = vld [vmem:[#allocation8 + $0x314] ss:$8 sps:$4 sm:$0xff]  }
  0x6d   :  { %540 = vmatpush1.bf16.msra.mxu1 %v4482_v35  ;;  %305 = vmatprep.subr.bf16.mxu0 %v4483_v36  ;;  %v4557_v35 = vld [vmem:[#allocation8 + $0x2a4] ss:$8 sps:$4 sm:$0xff]   ;;  %v4555_v36 = vld [vmem:[#allocation8 + $0x2a0] ss:$8 sps:$4 sm:$0xff]  }
  0x6e   :  { %541 = vmatprep.subr.bf16.mxu1 %v4485_v37  ;;  %v4560_v37 = vld [vmem:[#allocation8 + $0x2b4] ss:$8 sps:$4 sm:$0xff]  }
  0x70   :  { %306 = vmatpush1.bf16.msra.mxu0 %v4487_v38  ;;  %v4558_v38 = vld [vmem:[#allocation8 + $0x2b0] ss:$8 sps:$4 sm:$0xff]  }
  0x71   :  { %542 = vmatpush1.bf16.msra.mxu1 %v4488_v39  ;;  %307 = vmatprep.subr.bf16.mxu0 %v4489_v40  ;;  %v4563_v39 = vld [vmem:[#allocation8 + $0x2c4] ss:$8 sps:$4 sm:$0xff]   ;;  %v4561_v40 = vld [vmem:[#allocation8 + $0x2c0] ss:$8 sps:$4 sm:$0xff]  }
  0x72   :  { %543 = vmatprep.subr.bf16.mxu1 %v4491_v41  ;;  %v4566_v41 = vld [vmem:[#allocation8 + $0x2d4] ss:$8 sps:$4 sm:$0xff]  }
  0x74   :  { %308 = vmatpush1.bf16.msra.mxu0 %v4493_v42  ;;  %v4564_v42 = vld [vmem:[#allocation8 + $0x2d0] ss:$8 sps:$4 sm:$0xff]  }
  0x75   :  { %544 = vmatpush1.bf16.msra.mxu1 %v4494_v43  ;;  %309 = vmatprep.subr.bf16.mxu0 %v4495_v44  ;;  %v4569_v43 = vld [vmem:[#allocation8 + $0x2e4] ss:$8 sps:$4 sm:$0xff]   ;;  %v4567_v44 = vld [vmem:[#allocation8 + $0x2e0] ss:$8 sps:$4 sm:$0xff]  }
  0x76   :  { %545 = vmatprep.subr.bf16.mxu1 %v4497_v45  ;;  %v4572_v45 = vld [vmem:[#allocation8 + $0x2f4] ss:$8 sps:$4 sm:$0xff]  }
  0x78   :  { %310 = vmatpush1.bf16.msra.mxu0 %v4499_v50  ;;  %v4811_v50 = vmov 0.0  }
  0x79   :  { %546 = vmatpush1.bf16.msra.mxu1 %v4500_v51  ;;  %311 = vmatprep.subr.bf16.mxu0 %v4501_v52 }
  0x7a   :  { %547 = vmatprep.subr.bf16.mxu1 %v4503_v55 }
  0x7c   :  { %312 = vmatpush1.bf16.msra.mxu0 %v4505_v56 }
  0x7d   :  { %548 = vmatpush1.bf16.msra.mxu1 %v4506_v57  ;;  %313 = vmatprep.subr.bf16.mxu0 %v4507_v58 }
  0x7e   :  { %549 = vmatprep.subr.bf16.mxu1 %v4509_v59 }
  0x80   :  { %314 = vmatpush1.bf16.msra.mxu0 %v4511_v60 }
  0x81   :  { %550 = vmatpush1.bf16.msra.mxu1 %v4512_v61  ;;  %315 = vmatprep.subr.bf16.mxu0 %v4513_v62 }
  0x82   :  { %551 = vmatprep.subr.bf16.mxu1 %v4515_v63 }
  0x84   :  { %316 = vmatpush1.bf16.msra.mxu0 %v4517_v0 }
  0x85   :  { %552 = vmatpush1.bf16.msra.mxu1 %v4518_v1  ;;  %317 = vmatprep.subr.bf16.mxu0 %v4519_v2 }
  0x86   :  { %553 = vmatprep.subr.bf16.mxu1 %v4521_v3 }
  0x88   :  { %318 = vmatpush1.bf16.msra.mxu0 %v4523_v4 }
  0x89   :  { %554 = vmatpush1.bf16.msra.mxu1 %v4524_v5  ;;  %759 = vmatprep.subr.bf16.mxu0 %v4527_v10 }
  0x8a   :  { %4238 = vmatprep.subr.mxu1 %v4811_v50 }
  0x8b   :  { %320 = vmatmul.mubr.bf16.vlgmr.msra.gmra.mrb[0].mxu0 %v81_v11 }
  0x8c   :  { %556 = vmatmul.mubr.bf16.vlgmr.msra.gmra.mrb[0].mxu1 %v87_v12  ;;  %760 = vmatpush1.bf16.msra.mxu0 %v4525_v13 }
  0x8d   :  { %761 = vmatprep.subr.bf16.mxu0 %v4530_v14  ;;  %791 = vmatprep.mubr.bf16.mxu0 %v94_v19 }
  0x8e   :  { %4240 = vmatprep.mubr.msk.f32.mxu1 %vm4812_vm0, %v4811_v50 }
  0x90   :  { %762 = vmatpush1.bf16.msra.mxu0 %v4528_v16 }
  0x91   :  { %763 = vmatprep.subr.bf16.mxu0 %v4533_v17 }
  0x94   :  { %764 = vmatpush1.bf16.msra.mxu0 %v4531_v20 }
  0x95   :  { %765 = vmatprep.subr.bf16.mxu0 %v4536_v21 }
  0x98   :  { %766 = vmatpush1.bf16.msra.mxu0 %v4534_v22 }
  0x99   :  { %767 = vmatprep.subr.bf16.mxu0 %v4539_v23 }
  0x9c   :  { %768 = vmatpush1.bf16.msra.mxu0 %v4537_v24 }
  0x9d   :  { %769 = vmatprep.subr.bf16.mxu0 %v4542_v25 }
  0xa0   :  { %770 = vmatpush1.bf16.msra.mxu0 %v4540_v26 }
  0xa1   :  { %771 = vmatprep.subr.bf16.mxu0 %v4545_v27 }
  0xa4   :  { %772 = vmatpush1.bf16.msra.mxu0 %v4543_v28 }
  0xa5   :  { %773 = vmatprep.subr.bf16.mxu0 %v4548_v29 }
  0xa8   :  { %774 = vmatpush1.bf16.msra.mxu0 %v4546_v30 }
  0xa9   :  { %775 = vmatprep.subr.bf16.mxu0 %v4551_v31 }
  0xac   :  { %776 = vmatpush1.bf16.msra.mxu0 %v4549_v32 }
  0xad   :  { %777 = vmatprep.subr.bf16.mxu0 %v4554_v33  ;;  %v4994_v33 = vld [vmem:[#allocation8 + $0x324] ss:$8 sps:$4 sm:$0xff]  }
  0xb0   :  { %778 = vmatpush1.bf16.msra.mxu0 %v4552_v34 }
  0xb1   :  { %779 = vmatprep.subr.bf16.mxu0 %v4557_v35 }
  0xb4   :  { %780 = vmatpush1.bf16.msra.mxu0 %v4555_v36 }
  0xb5   :  { %781 = vmatprep.subr.bf16.mxu0 %v4560_v37  ;;  %v4997_v37 = vld [vmem:[#allocation8 + $0x320] ss:$8 sps:$4 sm:$0xff]  }
  0xb8   :  { %782 = vmatpush1.bf16.msra.mxu0 %v4558_v38 }
  0xb9   :  { %783 = vmatprep.subr.bf16.mxu0 %v4563_v39  ;;  %v4999_v39 = vld [vmem:[#allocation8 + $0x334] ss:$8 sps:$4 sm:$0xff]  }
  0xbc   :  { %784 = vmatpush1.bf16.msra.mxu0 %v4561_v40  ;;  %v5003_v40 = vld [vmem:[#allocation8 + $0x330] ss:$8 sps:$4 sm:$0xff]  }
  0xbd   :  { %785 = vmatprep.subr.bf16.mxu0 %v4566_v41  ;;  %v5007_v41 = vld [vmem:[#allocation8 + $0x304] ss:$8 sps:$4 sm:$0xff]  }
  0xc0   :  { %786 = vmatpush1.bf16.msra.mxu0 %v4564_v42  ;;  %v4815_v42 = vmov 0  }
  0xc1   :  { %787 = vmatprep.subr.bf16.mxu0 %v4569_v43 }
  0xc4   :  { %788 = vmatpush1.bf16.msra.mxu0 %v4567_v44  ;;  %v5011_v44 = vld [vmem:[#allocation8 + $0x300] ss:$8 sps:$4 sm:$0xff]  }
  0xc5   :  { %789 = vmatprep.subr.bf16.mxu0 %v4572_v45 }
  0xc8   :  { %790 = vmatpush1.bf16.msra.mxu0 %v4570_v46 }
  0xc9   :  { %4282 = vmatprep.subr.mxu0 %v4811_v50 }
  0xcb   :  { %792 = vmatmul.mubr.bf16.vlgmr.msra.gmra.mrb[4].mxu0 %v93_v49 }
  0xcc   :  { %4284 = vmatprep.mubr.msk.f32.mxu0 %vm4812_vm0, %v4811_v50 }
 0x15e   :  { %v4925_v51 = vpop.f32.mrb[0].mxu0 }
 0x15f   :  { %v4927_v52 = vpop.f32.mrb[0].mxu1  ;;  %v4931_v53 = vpop.f32.mrb[1].mxu0 }
 0x160   :  { %977 = vrot.lane.b32.xlu1 %v4927_v52, %s4813_s3  ;;  %v4933_v54 = vpop.f32.mrb[1].mxu1  ;;  %4239 = vmatpush3.xpose.msk.msra.mxu1 %vm836_vm1, %v4927_v52  ;;  %v4937_v55 = vpop.f32.mrb[2].mxu0 }
 0x161   :  { %v4939_v56 = vpop.f32.mrb[2].mxu1  ;;  %4283 = vmatpush3.xpose.msk.msra.mxu0 %vm836_vm1, %v4933_v54  ;;  %4243 = vmatprep.subr.bf16.mxu1 %v4811_v50  ;;  %v4944_v57 = vpop.f32.mrb[3].mxu0 }
 0x162   :  { %v4946_v58 = vpop.f32.mrb[3].mxu1  ;;  %4287 = vmatprep.subr.bf16.mxu0 %v4811_v50 }
 0x163   :  { %4241 = vmatmul.mubr.msk.f32.vlgmr.msra.gmra.mrb[4].mxu1 %vm836_vm1, %v4925_v51 }
 0x164   :  { %975 = vrot.lane.b32.xlu1 %v4925_v51, %s4813_s3  ;;  %4285 = vmatmul.mubr.msk.f32.vlgmr.msra.gmra.mrb[8].mxu0 %vm836_vm1, %v4931_v53 }
 0x165   :  { %4245 = vmatprep.mubr.msk.bf16.mxu1 %vm4812_vm0, %v4811_v50  ;;  %4289 = vmatprep.mubr.msk.bf16.mxu0 %vm4812_vm0, %v4811_v50 }
 0x19e   :  { %v793_v59 = vpop.f32.mrb[4].mxu0 }
 0x19f   :  { %v795_v60 = vpop.f32.mrb[5].mxu0  ;;  %v4967_v9 = vpack.c.bf16 %v793_v59, %v793_v59  ;;  %v5017_v59 = vld [vmem:[#allocation8 + $0x310] ss:$8 sps:$4 sm:$0xff]  }
 0x1a0   :  { %v4959_v61 = vpop.f32.mrb[6].mxu0  ;;  %v4971_v11 = vpack.c.bf16 %v795_v60, %v795_v60 }
 0x1a1   :  { %v4961_v62 = vpop.f32.mrb[7].mxu0  ;;  %v932_v10 = vsel %vm930_vm3, %v4967_v9, 0 }
 0x1a2   :  { %4244 = vmatpush3.bf16.msra.mxu1 %v932_v10  ;;  %v1746_v12 = vsel %vm930_vm3, %v4971_v11, 0 }
 0x1a3   :  { %4249 = vmatprep.subr.mxu1 %v4811_v50  ;;  %4288 = vmatpush3.bf16.msra.mxu0 %v1746_v12 }
 0x1a4   :  { %4293 = vmatprep.subr.mxu0 %v4811_v50 }
 0x1d2   :  { %v978_v17 = vpop.permute.xlu1 %977 }
 0x1d6   :  { %v976_v18 = vpop.permute.xlu1 %975 }
 0x236   :  { %v909_v63 = vpop.f32.mrb[4].mxu1 }
 0x237   :  { %v4242_v0 = vpop.f32.mrb[5].mxu1  ;;  %v4963_v1 = vpop.f32.mrb[8].mxu0  ;;  %v914_v2 = vsel %vm913_vm2, %v909_v63, -inf }
 0x238   :  { %915 = vmax.xlane.f32.xlu0 %v914_v2  ;;  %v4286_v3 = vpop.f32.mrb[9].mxu0 }
 0x2c5   :  { %v916_v4 = vpop.xlane.xlu0 %915 }
 0x2c6   :  { %v917_v5 = vsub.f32 %v909_v63, %v916_v4 }
 0x2c8   :  { %v918_v6 = vmul.f32 1.442695, %v917_v5 }
 0x2ca   :  { %4621 = vpow2.f32 %v918_v6 }
 0x2d4   :  { %v4622_v7 = vpop.eup %4621 }
 0x2d5   :  { %v920_v8 = vsel %vm913_vm2, %v4622_v7, 0.0 }
 0x2d6   :  { %921 = vadd.xlane.f32.xlu0 %v920_v8 }
 0x363   :  { %v922_v13 = vpop.xlane.xlu0 %921 }
 0x364   :  { %4623 = vrcp.f32 %v922_v13 }
 0x36e   :  { %v4624_v14 = vpop.eup %4623 }
 0x36f   :  { %v924_v15 = vmul.f32 %v4624_v14, %v4622_v7 }
 0x371   :  { %v925_v16 = vpack.c.bf16 %v924_v15, %v924_v15 }
 0x373   :  { %4246 = vmatmul.mubr.msk.bf16.vlgmr.msra.gmra.mrb[8].mxu1 %vm913_vm2, %v925_v16 }
 0x374   :  { %4250 = vmatpush3.xpose.msk.msra.mxu1 %vm836_vm1, %v978_v17  ;;  %4251 = vmatprep.mubr.msk.f32.mxu1 %vm4812_vm0, %v4811_v50  ;;  %v1729_v17 = vsel %vm913_vm2, %v4963_v1, -inf }
 0x375   :  { %4254 = vmatprep.subr.bf16.mxu1 %v4811_v50 }
 0x37b   :  { %4252 = vmatmul.mubr.msk.f32.vlgmr.msra.gmra.mrb[6].mxu1 %vm836_vm1, %v976_v18 }
 0x37c   :  { %4256 = vmatprep.mubr.msk.bf16.mxu1 %vm4812_vm0, %v4811_v50 }
 0x446   :  { %v968_v19 = vpop.f32.mrb[8].mxu1 }
 0x447   :  { %v4247_v20 = vpop.f32.mrb[9].mxu1  ;;  %v974_v60 = vpack.c.bf16 %v968_v19, %v968_v19 }
 0x448   :  { %v971_v21 = vpop.f32.mrb[10].mxu1 }
 0x449   :  { %v4248_v22 = vpop.f32.mrb[11].mxu1 }
 0x44e   :  { %v1049_v23 = vpop.f32.mrb[6].mxu1 }
 0x44f   :  { %v4253_v24 = vpop.f32.mrb[7].mxu1  ;;  %v1053_v25 = vsel %vm913_vm2, %v1049_v23, -inf }
 0x450   :  { %1054 = vmax.xlane.f32.xlu0 %v1053_v25 }
 0x466   :  { %1066 = vrot.lane.b32.xlu0 %v4967_v9, %s4813_s3 }
 0x46a   :  { %1245 = vrot.lane.b32.xlu0 %v4927_v52, %s4814_s18 }
 0x46e   :  { %1243 = vrot.lane.b32.xlu0 %v4925_v51, %s4814_s18 }
 0x4dd   :  { %v1055_v26 = vpop.xlane.xlu0 %1054 }
 0x4de   :  { %v1056_v27 = vsub.f32 %v1049_v23, %v1055_v26 }
 0x4e0   :  { %v1057_v28 = vmul.f32 1.442695, %v1056_v27 }
 0x4e1   :  { %v1067_v29 = vpop.permute.xlu0 %1066 }
 0x4e2   :  { %4625 = vpow2.f32 %v1057_v28  ;;  %v1072_v30 = vsel %vm930_vm3, %v1067_v29, 0  ;;  %v5051_v29 = vld [vmem:[#allocation8 + $0x344] ss:$8 sps:$4 sm:$0xff]  }
 0x4e3   :  { %4255 = vmatpush3.bf16.msra.mxu1 %v1072_v30 }
 0x4e4   :  { %1138 = vmatprep.subr.bf16.mxu1 %v4994_v33 }
 0x4e5   :  { %v1246_v63 = vpop.permute.xlu0 %1245 }
 0x4e9   :  { %v1244_v0 = vpop.permute.xlu0 %1243 }
 0x4ec   :  { %v4626_v31 = vpop.eup %4625 }
 0x4ed   :  { %v1059_v32 = vsel %vm913_vm2, %v4626_v31, 0.0 }
 0x4ee   :  { %1060 = vadd.xlane.f32.xlu1 %v1059_v32  ;;  %v5055_v32 = vld [vmem:[#allocation8 + $0x340] ss:$8 sps:$4 sm:$0xff]  }
 0x57b   :  { %v1061_v34 = vpop.xlane.xlu1 %1060 }
 0x57c   :  { %4627 = vrcp.f32 %v1061_v34  ;;  %v5057_v34 = vld [vmem:[#allocation8 + $0x354] ss:$8 sps:$4 sm:$0xff]  }
 0x586   :  { %v4628_v35 = vpop.eup %4627 }
 0x587   :  { %v1063_v36 = vmul.f32 %v4628_v35, %v4626_v31  ;;  %v5061_v35 = vld [vmem:[#allocation8 + $0x350] ss:$8 sps:$4 sm:$0xff]  }
 0x589   :  { %v1064_v38 = vpack.c.bf16 %v1063_v36, %v1063_v36 }
 0x58b   :  { %4257 = vmatmul.mubr.msk.bf16.vlgmr.msra.gmra.mrb[12].mxu1 %vm913_vm2, %v1064_v38 }
 0x58c   :  { %1139 = vmatpush1.bf16.msra.mxu1 %v4997_v37  ;;  %1170 = vmatprep.mubr.bf16.mxu1 %v4815_v42 }
 0x58d   :  { %1140 = vmatprep.subr.bf16.mxu1 %v4999_v39 }
 0x590   :  { %1141 = vmatpush1.bf16.msra.mxu1 %v5003_v40 }
 0x591   :  { %1202 = vmatprep.subr.bf16.mxu1 %v5007_v41 }
 0x65e   :  { %v1108_v43 = vpop.f32.mrb[12].mxu1 }
 0x65f   :  { %v1114_v45 = vpack.c.bf16 %v1108_v43, %v1108_v43  ;;  %v4258_v46 = vpop.f32.mrb[13].mxu1 }
 0x660   :  { %v1111_v48 = vpop.f32.mrb[14].mxu1 }
 0x661   :  { %v4259_v49 = vpop.f32.mrb[15].mxu1  ;;  %4088 = vmatmul.mubr.msk.bf16.vlgmr.msra.gmra.mrb[16].mxu1 %vm836_vm1, %v1114_v45 }
 0x662   :  { %1203 = vmatpush1.bf16.msra.mxu1 %v5011_v44  ;;  %1234 = vmatprep.mubr.bf16.mxu1 %v4815_v42 }
 0x663   :  { %1204 = vmatprep.subr.bf16.mxu1 %v5013_v47 }
 0x666   :  { %1205 = vmatpush1.bf16.msra.mxu1 %v5017_v59 }
 0x667   :  { %4260 = vmatprep.subr.mxu1 %v4811_v50 }
 0x669   :  { %4093 = vmatmul.mubr.msk.bf16.vlgmr.msra.gmra.mrb[20].mxu1 %vm836_vm1, %v974_v60 }
 0x66a   :  { %4262 = vmatprep.mubr.msk.f32.mxu1 %vm4812_vm0, %v4811_v50 }
 0x66f   :  { %4261 = vmatpush3.xpose.msk.msra.mxu1 %vm836_vm1, %v1246_v63 }
 0x670   :  { %4265 = vmatprep.subr.bf16.mxu1 %v4811_v50 }
 0x672   :  { %4263 = vmatmul.mubr.msk.f32.vlgmr.msra.gmra.mrb[24].mxu1 %vm836_vm1, %v1244_v0 }
 0x673   :  { %4267 = vmatprep.mubr.msk.bf16.mxu1 %vm4812_vm0, %v4811_v50 }
 0x734   :  { %v1172_v2 = vpop.f32.mrb[16].mxu1 }
 0x735   :  { %v1174_v3 = vpop.f32.mrb[17].mxu1 }
 0x736   :  { %v1176_v4 = vpop.f32.mrb[18].mxu1 }
 0x737   :  { %v1177_v5 = vpop.f32.mrb[19].mxu1 }
 0x73c   :  { %v1236_v6 = vpop.f32.mrb[20].mxu1 }
 0x73d   :  { %v5031_v7 = vadd.f32 %v1236_v6, %v1172_v2  ;;  %v1238_v8 = vpop.f32.mrb[21].mxu1 }
 0x73e   :  { %v5033_v10 = vadd.f32 %v1238_v8, %v1174_v3  ;;  %v1240_v12 = vpop.f32.mrb[22].mxu1 }
 0x73f   :  { %v1241_v13 = vpop.f32.mrb[23].mxu1 }
 0x745   :  { %v1317_v14 = vpop.f32.mrb[24].mxu1 }
 0x746   :  { %v4264_v15 = vpop.f32.mrb[25].mxu1  ;;  %v1321_v16 = vsel %vm913_vm2, %v1317_v14, -inf }
 0x747   :  { %1322 = vmax.xlane.f32.xlu0 %v1321_v16 }
 0x74b   :  { %1730 = vmax.xlane.f32.xlu0 %v1729_v17 }
 0x761   :  { %1857 = vrot.lane.b32.xlu0 %v4933_v54, %s4813_s3 }
 0x765   :  { %1855 = vrot.lane.b32.xlu0 %v4931_v53, %s4813_s3 }
 0x7d4   :  { %v1323_v18 = vpop.xlane.xlu0 %1322 }
 0x7d5   :  { %v1324_v19 = vsub.f32 %v1317_v14, %v1323_v18 }
 0x7d7   :  { %v1325_v20 = vmul.f32 1.442695, %v1324_v19 }
 0x7d8   :  { %v1731_v23 = vpop.xlane.xlu0 %1730 }
 0x7d9   :  { %4629 = vpow2.f32 %v1325_v20  ;;  %v1732_v24 = vsub.f32 %v4963_v1, %v1731_v23 }
 0x7db   :  { %v1733_v25 = vmul.f32 1.442695, %v1732_v24 }
 0x7dc   :  { %v1858_v49 = vpop.permute.xlu0 %1857 }
 0x7dd   :  { %4631 = vpow2.f32 %v1733_v25 }
 0x7e0   :  { %v1856_v60 = vpop.permute.xlu0 %1855 }
 0x7e3   :  { %v4630_v21 = vpop.eup %4629 }
 0x7e4   :  { %v1327_v22 = vsel %vm913_vm2, %v4630_v21, 0.0 }
 0x7e5   :  { %1328 = vadd.xlane.f32.xlu1 %v1327_v22 }
 0x7e7   :  { %v4632_v26 = vpop.eup %4631 }
 0x7e8   :  { %v1735_v27 = vsel %vm913_vm2, %v4632_v26, 0.0 }
 0x7f6   :  { %1333 = vrot.lane.b32.xlu1 %v4967_v9, %s4814_s18 }
 0x7fa   :  { %1450 = vrot.lane.b32.xlu1 %v4927_v52, %s4816_s19 }
 0x7fe   :  { %1448 = vrot.lane.b32.xlu1 %v4925_v51, %s4816_s19 }
 0x822   :  { %1736 = vadd.xlane.f32.xlu1 %v1735_v27 }
 0x872   :  { %v1329_v28 = vpop.xlane.xlu1 %1328 }
 0x873   :  { %4633 = vrcp.f32 %v1329_v28 }
 0x876   :  { %v1334_v30 = vpop.permute.xlu1 %1333 }
 0x877   :  { %v1339_v31 = vsel %vm930_vm3, %v1334_v30, 0 }
 0x878   :  { %4266 = vmatpush3.bf16.msra.mxu1 %v1339_v31 }
 0x879   :  { %1405 = vmatprep.subr.bf16.mxu1 %v5051_v29 }
 0x87a   :  { %v1451_v36 = vpop.permute.xlu1 %1450 }
 0x87d   :  { %v4634_v51 = vpop.eup %4633 }
 0x87e   :  { %v1331_v52 = vmul.f32 %v4634_v51, %v4630_v21  ;;  %v1449_v38 = vpop.permute.xlu1 %1448 }
 0x880   :  { %v1332_v1 = vpack.c.bf16 %v1331_v52, %v1331_v52 }
 0x882   :  { %4268 = vmatmul.mubr.msk.bf16.vlgmr.msra.gmra.mrb[28].mxu1 %vm913_vm2, %v1332_v1 }
 0x883   :  { %1406 = vmatpush1.bf16.msra.mxu1 %v5055_v32  ;;  %1437 = vmatprep.mubr.bf16.mxu1 %v4815_v42 }
 0x884   :  { %1407 = vmatprep.subr.bf16.mxu1 %v5057_v34 }
 0x887   :  { %1408 = vmatpush1.bf16.msra.mxu1 %v5061_v35 }
 0x888   :  { %4271 = vmatprep.subr.mxu1 %v4811_v50 }
 0x8af   :  { %v1737_v43 = vpop.xlane.xlu1 %1736 }
 0x8b0   :  { %4635 = vrcp.f32 %v1737_v43 }
 0x8ba   :  { %v4636_v45 = vpop.eup %4635 }
 0x8bb   :  { %v1739_v46 = vmul.f32 %v4636_v45, %v4632_v26 }
 0x8bd   :  { %v1740_v48 = vpack.c.bf16 %v1739_v46, %v1739_v46  ;;  %v5100_v46 = vld [vmem:[#allocation8 + $0x364] ss:$8 sps:$4 sm:$0xff]  }
 0x8bf   :  { %4290 = vmatmul.mubr.msk.bf16.vlgmr.msra.gmra.mrb[12].mxu0 %vm913_vm2, %v1740_v48  ;;  %v5102_v48 = vld [vmem:[#allocation8 + $0x360] ss:$8 sps:$4 sm:$0xff]  }
 0x8c0   :  { %4294 = vmatpush3.xpose.msk.msra.mxu0 %vm836_vm1, %v1858_v49  ;;  %4295 = vmatprep.mubr.msk.f32.mxu0 %vm4812_vm0, %v4811_v50  ;;  %v5106_v49 = vld [vmem:[#allocation8 + $0x370] ss:$8 sps:$4 sm:$0xff]  }
 0x8c7   :  { %4296 = vmatmul.mubr.msk.f32.vlgmr.msra.gmra.mrb[10].mxu0 %vm836_vm1, %v1856_v60  ;;  %v5108_v60 = vld [vmem:[#allocation8 + $0x374] ss:$8 sps:$4 sm:$0xff]  }
 0x8c8   :  { %2050 = vmatprep.mubr.bf16.mxu0 %v4815_v42 }
 0x955   :  { %v1375_v63 = vpop.f32.mrb[28].mxu1 }
 0x956   :  { %v1381_v0 = vpack.c.bf16 %v1375_v63, %v1375_v63  ;;  %v4269_v2 = vpop.f32.mrb[29].mxu1  ;;  %v5116_v63 = vld [vmem:[#allocation8 + $0x384] ss:$8 sps:$4 sm:$0xff]  }
 0x957   :  { %v1378_v3 = vpop.f32.mrb[30].mxu1 }
 0x958   :  { %v4270_v4 = vpop.f32.mrb[31].mxu1  ;;  %4101 = vmatmul.mubr.msk.bf16.vlgmr.msra.gmra.mrb[32].mxu1 %vm836_vm1, %v1381_v0  ;;  %v5119_v3 = vld [vmem:[#allocation8 + $0x380] ss:$8 sps:$4 sm:$0xff]  }
 0x959   :  { %4272 = vmatpush3.xpose.msk.msra.mxu1 %vm836_vm1, %v1451_v36  ;;  %4273 = vmatprep.mubr.msk.f32.mxu1 %vm4812_vm0, %v4811_v50 }
 0x95a   :  { %4276 = vmatprep.subr.bf16.mxu1 %v4811_v50 }
 0x960   :  { %4274 = vmatmul.mubr.msk.f32.vlgmr.msra.gmra.mrb[26].mxu1 %vm836_vm1, %v1449_v38 }
 0x961   :  { %4278 = vmatprep.mubr.msk.bf16.mxu1 %vm4812_vm0, %v4811_v50 }
 0x992   :  { %v5081_v5 = vpop.f32.mrb[12].mxu0 }
 0x993   :  { %v4291_v6 = vpop.f32.mrb[13].mxu0 }
 0x994   :  { %v1785_v8 = vpop.f32.mrb[14].mxu0 }
 0x995   :  { %v4292_v12 = vpop.f32.mrb[15].mxu0  ;;  %v5121_v8 = vld [vmem:[#allocation8 + $0x394] ss:$8 sps:$4 sm:$0xff]  }
 0x99a   :  { %v1929_v13 = vpop.f32.mrb[10].mxu0 }
 0x99b   :  { %v4297_v14 = vpop.f32.mrb[11].mxu0 }
 0x99c   :  { %v5125_v14 = vld [vmem:[#allocation8 + $0x390] ss:$8 sps:$4 sm:$0xff]  }
 0xa2b   :  { %v1439_v15 = vpop.f32.mrb[32].mxu1 }
 0xa2c   :  { %v5084_v16 = vadd.f32 %v1439_v15, %v5031_v7  ;;  %v1441_v17 = vpop.f32.mrb[33].mxu1  ;;  %v1933_v7 = vsel %vm913_vm2, %v1929_v13, -inf }
 0xa2d   :  { %v5087_v18 = vadd.f32 %v1441_v17, %v5033_v10  ;;  %v1443_v19 = vpop.f32.mrb[34].mxu1  ;;  %v1788_v17 = vpack.c.bf16 %v5081_v5, %v5081_v5 }
 0xa2e   :  { %v1444_v20 = vpop.f32.mrb[35].mxu1 }
 0xa33   :  { %v1522_v21 = vpop.f32.mrb[26].mxu1 }
 0xa34   :  { %v4275_v22 = vpop.f32.mrb[27].mxu1  ;;  %v1526_v23 = vsel %vm913_vm2, %v1522_v21, -inf }
 0xa35   :  { %1527 = vmax.xlane.f32.xlu0 %v1526_v23 }
 0xac2   :  { %v1528_v24 = vpop.xlane.xlu0 %1527 }
 0xac3   :  { %v1529_v25 = vsub.f32 %v1522_v21, %v1528_v24  ;;  %v5146_v24 = vld [vmem:[#allocation8 + $0x3a4] ss:$8 sps:$4 sm:$0xff]  }
 0xac4   :  { %2018 = vmatprep.subr.bf16.mxu0 %v5146_v24 }
 0xac5   :  { %v1530_v26 = vmul.f32 1.442695, %v1529_v25  ;;  %v5148_v25 = vld [vmem:[#allocation8 + $0x3a0] ss:$8 sps:$4 sm:$0xff]  }
 0xac6   :  { %2019 = vmatpush1.bf16.msra.mxu0 %v5148_v25 }
 0xac7   :  { %4637 = vpow2.f32 %v1530_v26  ;;  %v5150_v26 = vld [vmem:[#allocation8 + $0x3b4] ss:$8 sps:$4 sm:$0xff]  }
 0xac8   :  { %2020 = vmatprep.subr.bf16.mxu0 %v5150_v26 }
 0xad1   :  { %v4638_v27 = vpop.eup %4637 }
 0xad2   :  { %v1532_v28 = vsel %vm913_vm2, %v4638_v27, 0.0 }
 0xad3   :  { %1533 = vadd.xlane.f32.xlu1 %v1532_v28 }
 0xae4   :  { %1538 = vrot.lane.b32.xlu1 %v4967_v9, %s4816_s19 }
 0xb08   :  { %1934 = vmax.xlane.f32.xlu1 %v1933_v7 }
 0xb60   :  { %v1534_v10 = vpop.xlane.xlu1 %1533 }
 0xb61   :  { %4639 = vrcp.f32 %v1534_v10 }
 0xb64   :  { %v1539_v30 = vpop.permute.xlu1 %1538 }
 0xb65   :  { %v1544_v31 = vsel %vm930_vm3, %v1539_v30, 0 }
 0xb66   :  { %4277 = vmatpush3.bf16.msra.mxu1 %v1544_v31 }
 0xb67   :  { %1610 = vmatprep.subr.bf16.mxu1 %v5100_v46 }
 0xb6b   :  { %v4640_v51 = vpop.eup %4639 }
 0xb6c   :  { %v1536_v52 = vmul.f32 %v4640_v51, %v4638_v27  ;;  %v5154_v27 = vld [vmem:[#allocation8 + $0x3b0] ss:$8 sps:$4 sm:$0xff]  }
 0xb6d   :  { %2021 = vmatpush1.bf16.msra.mxu0 %v5154_v27 }
 0xb6e   :  { %v1537_v1 = vpack.c.bf16 %v1536_v52, %v1536_v52 }
 0xb70   :  { %4279 = vmatmul.mubr.msk.bf16.vlgmr.msra.gmra.mrb[36].mxu1 %vm913_vm2, %v1537_v1 }
 0xb71   :  { %1642 = vmatprep.mubr.bf16.mxu1 %v4815_v42  ;;  %1611 = vmatpush1.bf16.msra.mxu1 %v5102_v48 }
 0xb72   :  { %1612 = vmatprep.subr.bf16.mxu1 %v5108_v60 }
 0xb75   :  { %1613 = vmatpush1.bf16.msra.mxu1 %v5106_v49 }
 0xb76   :  { %1812 = vmatprep.subr.bf16.mxu1 %v5116_v63 }
 0xb95   :  { %v1935_v36 = vpop.xlane.xlu1 %1934 }
 0xb96   :  { %v1936_v38 = vsub.f32 %v1929_v13, %v1935_v36 }
 0xb98   :  { %v1937_v43 = vmul.f32 1.442695, %v1936_v38 }
 0xb9a   :  { %4641 = vpow2.f32 %v1937_v43 }
 0xba4   :  { %v4642_v9 = vpop.eup %4641 }
 0xba5   :  { %v1939_v45 = vsel %vm913_vm2, %v4642_v9, 0.0 }
 0xba6   :  { %1940 = vadd.xlane.f32.xlu0 %v1939_v45 }
 0xbbc   :  { %1946 = vrot.lane.b32.xlu0 %v4971_v11, %s4813_s3 }
 0xbc0   :  { %2063 = vrot.lane.b32.xlu0 %v4933_v54, %s4814_s18 }
 0xbc4   :  { %2061 = vrot.lane.b32.xlu0 %v4931_v53, %s4814_s18 }
 0xc33   :  { %v1941_v0 = vpop.xlane.xlu0 %1940 }
 0xc34   :  { %4643 = vrcp.f32 %v1941_v0 }
 0xc37   :  { %v1947_v15 = vpop.permute.xlu0 %1946 }
 0xc38   :  { %v1952_v20 = vsel %vm930_vm3, %v1947_v15, 0 }
 0xc3b   :  { %v2064_v23 = vpop.permute.xlu0 %2063 }
 0xc3e   :  { %v4644_v19 = vpop.eup %4643 }
 0xc3f   :  { %v1943_v21 = vmul.f32 %v4644_v19, %v4642_v9  ;;  %v2062_v5 = vpop.permute.xlu0 %2061 }
 0xc41   :  { %v1944_v22 = vpack.c.bf16 %v1943_v21, %v1943_v21 }
 0xc43   :  { %v1580_v2 = vpop.f32.mrb[36].mxu1 }
 0xc44   :  { %v1586_v4 = vpack.c.bf16 %v1580_v2, %v1580_v2  ;;  %v4280_v6 = vpop.f32.mrb[37].mxu1 }
 0xc45   :  { %v1583_v12 = vpop.f32.mrb[38].mxu1 }
 0xc46   :  { %v4281_v13 = vpop.f32.mrb[39].mxu1  ;;  %4109 = vmatmul.mubr.msk.bf16.vlgmr.msra.gmra.mrb[40].mxu1 %vm836_vm1, %v1586_v4 }
 0xc47   :  { %1813 = vmatpush1.bf16.msra.mxu1 %v5119_v3  ;;  %1844 = vmatprep.mubr.bf16.mxu1 %v4815_v42 }
 0xc48   :  { %1814 = vmatprep.subr.bf16.mxu1 %v5121_v8 }
 0xc4b   :  { %1815 = vmatpush1.bf16.msra.mxu1 %v5125_v14 }
 0xc4c   :  { %4298 = vmatprep.subr.bf16.mxu1 %v4811_v50 }
 0xc4e   :  { %4117 = vmatmul.mubr.msk.bf16.vlgmr.msra.gmra.mrb[44].mxu1 %vm836_vm1, %v1788_v17 }
 0xc4f   :  { %4299 = vmatpush3.bf16.msra.mxu1 %v1952_v20  ;;  %4300 = vmatprep.mubr.msk.bf16.mxu1 %vm4812_vm0, %v4811_v50 }
 0xc50   :  { %4304 = vmatprep.subr.mxu1 %v4811_v50 }
 0xc56   :  { %4301 = vmatmul.mubr.msk.bf16.vlgmr.msra.gmra.mrb[48].mxu1 %vm913_vm2, %v1944_v22 }
 0xc57   :  { %4306 = vmatprep.mubr.msk.f32.mxu1 %vm4812_vm0, %v4811_v50 }
 0xc58   :  { %4305 = vmatpush3.xpose.msk.msra.mxu1 %vm836_vm1, %v2064_v23  ;;  %v5172_v23 = vld [vmem:[#allocation8 + $0x3c0] ss:$8 sps:$4 sm:$0xff]  }
 0xc59   :  { %4309 = vmatprep.subr.bf16.mxu1 %v4811_v50 }
 0xc5e   :  { %4307 = vmatmul.mubr.msk.f32.vlgmr.msra.gmra.mrb[52].mxu1 %vm836_vm1, %v2062_v5  ;;  %v5176_v5 = vld [vmem:[#allocation8 + $0x3d4] ss:$8 sps:$4 sm:$0xff]  }
 0xc5f   :  { %4311 = vmatprep.mubr.msk.bf16.mxu1 %vm4812_vm0, %v4811_v50 }
 0xd19   :  { %v1644_v28 = vpop.f32.mrb[40].mxu1 }
 0xd1a   :  { %v1651_v7 = vadd.f32 %v1644_v28, %v5084_v16  ;;  %v1646_v10 = vpop.f32.mrb[41].mxu1 }
 0xd1b   :  { %v1652_v30 = vadd.f32 %v1646_v10, %v5087_v18  ;;  %v1648_v31 = vpop.f32.mrb[42].mxu1 }
 0xd1c   :  { %v1649_v51 = vpop.f32.mrb[43].mxu1 }
 0xd21   :  { %v1846_v52 = vpop.f32.mrb[44].mxu1 }
 0xd22   :  { %v1853_v1 = vadd.f32 %v1846_v52, %v1651_v7  ;;  %v1848_v36 = vpop.f32.mrb[45].mxu1 }
 0xd23   :  { %v1854_v38 = vadd.f32 %v1848_v36, %v1652_v30  ;;  %v1850_v43 = vpop.f32.mrb[46].mxu1 }
 0xd24   :  { %v1851_v9 = vpop.f32.mrb[47].mxu1 }
 0xd29   :  { %v1988_v45 = vpop.f32.mrb[48].mxu1 }
 0xd2a   :  { %v1994_v0 = vpack.c.bf16 %v1988_v45, %v1988_v45  ;;  %v4302_v2 = vpop.f32.mrb[49].mxu1 }
 0xd2b   :  { %v1991_v4 = vpop.f32.mrb[50].mxu1 }
 0xd2c   :  { %v4303_v6 = vpop.f32.mrb[51].mxu1  ;;  %4125 = vmatmul.mubr.msk.bf16.vlgmr.msra.gmra.mrb[16].mxu0 %vm836_vm1, %v1994_v0 }
 0xd2d   :  { %2255 = vmatprep.mubr.bf16.mxu0 %v4815_v42 }
 0xd31   :  { %v2135_v16 = vpop.f32.mrb[52].mxu1 }
 0xd32   :  { %v4308_v12 = vpop.f32.mrb[53].mxu1  ;;  %v2139_v18 = vsel %vm913_vm2, %v2135_v16, -inf }
 0xd33   :  { %2140 = vmax.xlane.f32.xlu1 %v2139_v18 }
 0xd44   :  { %2151 = vrot.lane.b32.xlu1 %v4971_v11, %s4814_s18 }
 0xd48   :  { %2268 = vrot.lane.b32.xlu1 %v4933_v54, %s4816_s19  ;;  %v5174_v54 = vld [vmem:[#allocation8 + $0x3c4] ss:$8 sps:$4 sm:$0xff]  }
 0xd49   :  { %2223 = vmatprep.subr.bf16.mxu0 %v5174_v54 }
 0xd4a   :  { %2224 = vmatpush1.bf16.msra.mxu0 %v5172_v23 }
 0xd4b   :  { %2225 = vmatprep.subr.bf16.mxu0 %v5176_v5 }
 0xd4c   :  { %2266 = vrot.lane.b32.xlu1 %v4931_v53, %s4816_s19  ;;  %v5180_v53 = vld [vmem:[#allocation8 + $0x3d0] ss:$8 sps:$4 sm:$0xff]  }
 0xd4e   :  { %2226 = vmatpush1.bf16.msra.mxu0 %v5180_v53 }
 0xd4f   :  { %4320 = vmatprep.subr.bf16.mxu0 %v4811_v50 }
 0xdc0   :  { %v2141_v13 = vpop.xlane.xlu1 %2140 }
 0xdc1   :  { %v2142_v15 = vsub.f32 %v2135_v16, %v2141_v13 }
 0xdc3   :  { %v2143_v17 = vmul.f32 1.442695, %v2142_v15 }
 0xdc4   :  { %v2152_v19 = vpop.permute.xlu1 %2151 }
 0xdc5   :  { %4645 = vpow2.f32 %v2143_v17  ;;  %v2157_v20 = vsel %vm930_vm3, %v2152_v19, 0 }
 0xdc6   :  { %4310 = vmatpush3.bf16.msra.mxu1 %v2157_v20 }
 0xdc7   :  { %4315 = vmatprep.subr.mxu1 %v4811_v50 }
 0xdc8   :  { %v2269_v45 = vpop.permute.xlu1 %2268 }
 0xdcc   :  { %v2267_v0 = vpop.permute.xlu1 %2266 }
 0xdcf   :  { %v4646_v21 = vpop.eup %4645 }
 0xdd0   :  { %v2145_v22 = vsel %vm913_vm2, %v4646_v21, 0.0 }
 0xdd1   :  { %2146 = vadd.xlane.f32.xlu0 %v2145_v22  ;;  %v5204_v22 = vld [vmem:[#allocation8 + $0x3e4] ss:$8 sps:$4 sm:$0xff]  }
 0xdff   :  { %v2052_v28 = vpop.f32.mrb[16].mxu0 }
 0xe00   :  { %v2059_v7 = vadd.f32 %v2052_v28, %v1853_v1  ;;  %v2054_v10 = vpop.f32.mrb[17].mxu0  ;;  %v5206_v28 = vld [vmem:[#allocation8 + $0x3f4] ss:$8 sps:$4 sm:$0xff]  }
 0xe01   :  { %v2060_v30 = vadd.f32 %v2054_v10, %v1854_v38  ;;  %v2056_v31 = vpop.f32.mrb[18].mxu0  ;;  %v5210_v10 = vld [vmem:[#allocation8 + $0x3f0] ss:$8 sps:$4 sm:$0xff]  }
 0xe02   :  { %v2057_v51 = vpop.f32.mrb[19].mxu0 }
 0xe5e   :  { %v2147_v52 = vpop.xlane.xlu0 %2146 }
 0xe5f   :  { %4647 = vrcp.f32 %v2147_v52 }
 0xe69   :  { %v4648_v36 = vpop.eup %4647 }
 0xe6a   :  { %v2149_v43 = vmul.f32 %v4648_v36, %v4646_v21  ;;  %v5202_v21 = vld [vmem:[#allocation8 + $0x3e0] ss:$8 sps:$4 sm:$0xff]  }
 0xe6c   :  { %v2150_v9 = vpack.c.bf16 %v2149_v43, %v2149_v43 }
 0xe6e   :  { %4312 = vmatmul.mubr.msk.bf16.vlgmr.msra.gmra.mrb[56].mxu1 %vm913_vm2, %v2150_v9 }
 0xe6f   :  { %4316 = vmatpush3.xpose.msk.msra.mxu1 %vm836_vm1, %v2269_v45  ;;  %4317 = vmatprep.mubr.msk.f32.mxu1 %vm4812_vm0, %v4811_v50 }
 0xe70   :  { %2428 = vmatprep.subr.bf16.mxu1 %v5204_v22 }
 0xe76   :  { %4318 = vmatmul.mubr.msk.f32.vlgmr.msra.gmra.mrb[54].mxu1 %vm836_vm1, %v2267_v0 }
 0xe77   :  { %2460 = vmatprep.mubr.bf16.mxu1 %v4815_v42  ;;  %2429 = vmatpush1.bf16.msra.mxu1 %v5202_v21 }
 0xe78   :  { %2430 = vmatprep.subr.bf16.mxu1 %v5206_v28 }
 0xe7b   :  { %2431 = vmatpush1.bf16.msra.mxu1 %v5210_v10 }
 0xe7c   :  { %4337 = vmatprep.subr.mxu1 %v4811_v50 }
 0xf41   :  { %v2193_v1 = vpop.f32.mrb[56].mxu1 }
 0xf42   :  { %v2199_v38 = vpack.c.bf16 %v2193_v1, %v2193_v1  ;;  %v4313_v2 = vpop.f32.mrb[57].mxu1 }
 0xf43   :  { %v2196_v4 = vpop.f32.mrb[58].mxu1 }
 0xf44   :  { %v4314_v6 = vpop.f32.mrb[59].mxu1  ;;  %4133 = vmatmul.mubr.msk.bf16.vlgmr.msra.gmra.mrb[20].mxu0 %vm836_vm1, %v2199_v38 }
 0xf45   :  { %4322 = vmatprep.mubr.msk.bf16.mxu0 %vm4812_vm0, %v4811_v50 }
 0xf49   :  { %v2340_v16 = vpop.f32.mrb[54].mxu1 }
 0xf4a   :  { %v4319_v12 = vpop.f32.mrb[55].mxu1  ;;  %v2344_v18 = vsel %vm913_vm2, %v2340_v16, -inf }
 0xf4b   :  { %2345 = vmax.xlane.f32.xlu1 %v2344_v18 }
 0xfd8   :  { %v2346_v13 = vpop.xlane.xlu1 %2345 }
 0xfd9   :  { %v2347_v15 = vsub.f32 %v2340_v16, %v2346_v13 }
 0xfdb   :  { %v2348_v17 = vmul.f32 1.442695, %v2347_v15 }
 0xfdd   :  { %4649 = vpow2.f32 %v2348_v17 }
 0xfe7   :  { %v4650_v19 = vpop.eup %4649 }
 0xfe8   :  { %v2350_v20 = vsel %vm913_vm2, %v4650_v19, 0.0 }
 0xfe9   :  { %2351 = vadd.xlane.f32.xlu0 %v2350_v20 }
 0xfff   :  { %2356 = vrot.lane.b32.xlu0 %v4971_v11, %s4816_s19 }
0x1003   :  { %2624 = vrot.lane.b32.xlu0 %v4939_v56, %s4813_s3 }
0x1007   :  { %2622 = vrot.lane.b32.xlu0 %v4937_v55, %s4813_s3 }
0x1017   :  { %v2257_v11 = vpop.f32.mrb[20].mxu0 }
0x1018   :  { %v2264_v31 = vadd.f32 %v2257_v11, %v2059_v7  ;;  %v2259_v51 = vpop.f32.mrb[21].mxu0  ;;  %v5225_v7 = vpack.c.bf16 %v4959_v61, %v4959_v61  ;;  %v835_v11 = vld [vmem:[%s5437_s4] sm:$0x3]  ;;  %s4817_s4 = smov [#allocation10]  }
0x1019   :  { %v2265_v52 = vadd.f32 %v2259_v51, %v2060_v30  ;;  %v2261_v36 = vpop.f32.mrb[22].mxu0  ;;  %s3968_s23 = sshll.u32 %s4817_s4, 4  ;;  %s3969_s23 = int_to_ptr.vmem [resolvable:$true] %s3968_s23 }
0x101a   :  { %v2262_v43 = vpop.f32.mrb[23].mxu0  ;;  %v2579_v30 = vsel %vm930_vm3, %v5225_v7, 0  ;;  %s4773_s24 = scalar_lea.vmem %s3969_s23, 512  ;;  %p4778_p5 = scmp.lt.s32.totalorder %s3969_s23, %s3969_s23 }
0x101b   :  { %p4774_p4 = scmp.ne.s32.totalorder %s3969_s23, %s4773_s24  ;;  %p4779_p6 = scmp.lt.s32.totalorder %s4773_s24, %s4773_s24 }
0x101d   :  { %p4780_p7 = por %p4779_p6, %p4778_p5 }
0x101f   :  { %p4781_p8 = pnand %p4780_p7, %p4774_p4 }
0x1076   :  { %v2352_v9 = vpop.xlane.xlu0 %2351 }
0x1077   :  { %4651 = vrcp.f32 %v2352_v9 }
0x107a   :  { %v2357_v45 = vpop.permute.xlu0 %2356 }
0x107b   :  { %v2362_v0 = vsel %vm930_vm3, %v2357_v45, 0 }
0x107c   :  { %4321 = vmatpush3.bf16.msra.mxu0 %v2362_v0 }
0x107d   :  { %4326 = vmatprep.subr.mxu0 %v4811_v50 }
0x107e   :  { %v2625_v18 = vpop.permute.xlu0 %2624 }
0x1081   :  { %v4652_v1 = vpop.eup %4651 }
0x1082   :  { %v2354_v38 = vmul.f32 %v4652_v1, %v4650_v19  ;;  %v2623_v17 = vpop.permute.xlu0 %2622 }
0x1084   :  { %v2355_v2 = vpack.c.bf16 %v2354_v38, %v2354_v38 }
0x1086   :  { %4323 = vmatmul.mubr.msk.bf16.vlgmr.msra.gmra.mrb[24].mxu0 %vm913_vm2, %v2355_v2 }
0x1087   :  { %4327 = vmatpush3.xpose.msk.msra.mxu0 %vm836_vm1, %v4939_v56  ;;  %4328 = vmatprep.mubr.msk.f32.mxu0 %vm4812_vm0, %v4811_v50 }
0x1088   :  { %4331 = vmatprep.subr.bf16.mxu0 %v4811_v50 }
0x108e   :  { %4329 = vmatmul.mubr.msk.f32.vlgmr.msra.gmra.mrb[28].mxu0 %vm836_vm1, %v4937_v55 }
0x108f   :  { %4332 = vmatpush3.bf16.msra.mxu0 %v2579_v30  ;;  %4333 = vmatprep.mubr.msk.bf16.mxu0 %vm4812_vm0, %v4811_v50 }
0x1090   :  { %2765 = vmatprep.subr.bf16.mxu0 %v4994_v33  ;;  %v2472_v33 = vlaneseq }
0x1092   :  { %v2473_v19 = vshrl.u32 %v2472_v33, 7 }
0x1094   :  { %v2474_v20 = vsub.s32 0, %v2473_v19  ;;  %v2478_v51 = vsub.s32 1, %v2473_v19 }
0x1096   :  { %v5245_v36 = vrot.slane %v835_v11, %v2474_v20  ;;  %v5247_v9 = vrot.slane %v835_v11, %v2478_v51 }
0x1159   :  { %v2398_v4 = vpop.f32.mrb[24].mxu0 }
0x115a   :  { %v2404_v6 = vpack.c.bf16 %v2398_v4, %v2398_v4  ;;  %v4324_v16 = vpop.f32.mrb[25].mxu0 }
0x115b   :  { %v2401_v12 = vpop.f32.mrb[26].mxu0 }
0x115c   :  { %v4325_v13 = vpop.f32.mrb[27].mxu0  ;;  %4141 = vmatmul.mubr.msk.bf16.vlgmr.msra.gmra.mrb[60].mxu1 %vm836_vm1, %v2404_v6 }
0x115d   :  { %4338 = vmatpush3.xpose.msk.msra.mxu1 %vm836_vm1, %v2625_v18  ;;  %4339 = vmatprep.mubr.msk.f32.mxu1 %vm4812_vm0, %v4811_v50 }
0x115e   :  { %4342 = vmatprep.subr.bf16.mxu1 %v4811_v50 }
0x1161   :  { %v2558_v61 = vpop.f32.mrb[28].mxu0 }
0x1162   :  { %v4330_v15 = vpop.f32.mrb[29].mxu0 }
0x1164   :  { %4340 = vmatmul.mubr.msk.f32.vlgmr.msra.gmra.mrb[64].mxu1 %vm836_vm1, %v2623_v17 }
0x1165   :  { %4344 = vmatprep.mubr.msk.bf16.mxu1 %vm4812_vm0, %v4811_v50 }
0x122f   :  { %v2462_v43 = vpop.f32.mrb[60].mxu1 }
0x1230   :  { %v2469_v45 = vadd.f32 %v2462_v43, %v2264_v31  ;;  %v2464_v0 = vpop.f32.mrb[61].mxu1  ;;  %v2562_v31 = vsel %vm913_vm2, %v2558_v61, -inf }
0x1231   :  { %v2470_v1 = vadd.f32 %v2464_v0, %v2265_v52  ;;  %v2466_v38 = vpop.f32.mrb[62].mxu1 }
0x1232   :  { %v2482_v2 = vadd.f32 %v5245_v36, %v2469_v45  ;;  %v2467_v30 = vpop.f32.mrb[63].mxu1 }
0x1233   :  { %v2483_v4 = vadd.f32 %v5247_v9, %v2470_v1 }
0x1234   :  { %2484 = vst [vmem:[#allocation10] sm:$0xff] %v2482_v2 }
0x1235   :  { %2485 = vst [vmem:[#allocation10 + $0x8] sm:$0xff] %v2483_v4 }
0x1237   :  { %v2696_v6 = vpop.f32.mrb[64].mxu1 }
0x1238   :  { %v4341_v16 = vpop.f32.mrb[65].mxu1  ;;  %v2700_v12 = vsel %vm913_vm2, %v2696_v6, -inf }
0x1239   :  { %2701 = vmax.xlane.f32.xlu1 %v2700_v12 }
0x124a   :  { %2713 = vrot.lane.b32.xlu1 %v5225_v7, %s4813_s3 }
0x126e   :  { %2563 = vmax.xlane.f32.xlu1 %v2562_v31 }
0x127f   :  { %2850 = vrot.lane.b32.xlu1 %v4937_v55, %s4814_s18 }
0x12c6   :  { %v2702_v52 = vpop.xlane.xlu1 %2701 }
0x12c7   :  { %v2703_v18 = vsub.f32 %v2696_v6, %v2702_v52 }
0x12c9   :  { %v2704_v13 = vmul.f32 1.442695, %v2703_v18 }
0x12ca   :  { %v2714_v15 = vpop.permute.xlu1 %2713 }
0x12cb   :  { %4653 = vpow2.f32 %v2704_v13  ;;  %v2719_v17 = vsel %vm930_vm3, %v2714_v15, 0 }
0x12cc   :  { %4343 = vmatpush3.bf16.msra.mxu1 %v2719_v17 }
0x12cd   :  { %2809 = vmatprep.subr.bf16.mxu1 %v5007_v41 }
0x12d5   :  { %v4654_v33 = vpop.eup %4653 }
0x12d6   :  { %v2706_v19 = vsel %vm913_vm2, %v4654_v33, 0.0 }
0x12d7   :  { %2707 = vadd.xlane.f32.xlu0 %v2706_v19 }
0x12fb   :  { %v2564_v20 = vpop.xlane.xlu1 %2563 }
0x12fc   :  { %v2565_v11 = vsub.f32 %v2558_v61, %v2564_v20 }
0x12fe   :  { %v2566_v51 = vmul.f32 1.442695, %v2565_v11 }
0x1300   :  { %4655 = vpow2.f32 %v2566_v51 }
0x130a   :  { %v4656_v43 = vpop.eup %4655 }
0x130b   :  { %v2568_v45 = vsel %vm913_vm2, %v4656_v43, 0.0 }
0x130c   :  { %2569 = vadd.xlane.f32.xlu0 %v2568_v45 }
0x1322   :  { %2852 = vrot.lane.b32.xlu0 %v4939_v56, %s4814_s18 }
0x1364   :  { %v2708_v0 = vpop.xlane.xlu0 %2707 }
0x1365   :  { %4657 = vrcp.f32 %v2708_v0 }
0x136f   :  { %v4658_v1 = vpop.eup %4657 }
0x1370   :  { %v2710_v38 = vmul.f32 %v4658_v1, %v4654_v33 }
0x1372   :  { %v2711_v41 = vpack.c.bf16 %v2710_v38, %v2710_v38 }
0x1374   :  { %4345 = vmatmul.mubr.msk.bf16.vlgmr.msra.gmra.mrb[68].mxu1 %vm913_vm2, %v2711_v41 }
0x1375   :  { %2810 = vmatpush1.bf16.msra.mxu1 %v5011_v44  ;;  %2841 = vmatprep.mubr.bf16.mxu1 %v4815_v42 }
0x1376   :  { %2811 = vmatprep.subr.bf16.mxu1 %v5013_v47 }
0x1379   :  { %2812 = vmatpush1.bf16.msra.mxu1 %v5017_v59 }
0x137a   :  { %2992 = vmatprep.subr.bf16.mxu1 %v5051_v29 }
0x1399   :  { %v2570_v61 = vpop.xlane.xlu0 %2569 }
0x139a   :  { %4659 = vrcp.f32 %v2570_v61 }
0x139d   :  { %v2853_v6 = vpop.permute.xlu0 %2852 }
0x13a4   :  { %v4660_v2 = vpop.eup %4659 }
0x13a5   :  { %v2572_v30 = vmul.f32 %v4660_v2, %v4656_v43 }
0x13a7   :  { %v2573_v4 = vpack.c.bf16 %v2572_v30, %v2572_v30 }
0x13a9   :  { %4334 = vmatmul.mubr.msk.bf16.vlgmr.msra.gmra.mrb[32].mxu0 %vm913_vm2, %v2573_v4 }
0x13aa   :  { %2766 = vmatpush1.bf16.msra.mxu0 %v4997_v37  ;;  %2797 = vmatprep.mubr.bf16.mxu0 %v4815_v42  ;;  %v2851_v37 = vpop.permute.xlu1 %2850 }
0x13ab   :  { %2767 = vmatprep.subr.bf16.mxu0 %v4999_v39 }
0x13ae   :  { %2768 = vmatpush1.bf16.msra.mxu0 %v5003_v40 }
0x13af   :  { %4348 = vmatprep.subr.mxu0 %v4811_v50 }
0x1447   :  { %v2755_v44 = vpop.f32.mrb[68].mxu1 }
0x1448   :  { %v2761_v47 = vpack.c.bf16 %v2755_v44, %v2755_v44  ;;  %v4346_v59 = vpop.f32.mrb[69].mxu1 }
0x1449   :  { %v2758_v29 = vpop.f32.mrb[70].mxu1 }
0x144a   :  { %v4347_v16 = vpop.f32.mrb[71].mxu1  ;;  %4148 = vmatmul.mubr.msk.bf16.vlgmr.msra.gmra.mrb[36].mxu0 %vm836_vm1, %v2761_v47 }
0x144b   :  { %4349 = vmatpush3.xpose.msk.msra.mxu0 %vm836_vm1, %v2853_v6  ;;  %4350 = vmatprep.mubr.msk.f32.mxu0 %vm4812_vm0, %v4811_v50 }
0x144c   :  { %4353 = vmatprep.subr.bf16.mxu0 %v4811_v50 }
0x1452   :  { %4351 = vmatmul.mubr.msk.f32.vlgmr.msra.gmra.mrb[30].mxu0 %vm836_vm1, %v2851_v37 }
0x1453   :  { %4355 = vmatprep.mubr.msk.bf16.mxu0 %vm4812_vm0, %v4811_v50 }
0x147c   :  { %v2615_v39 = vpop.f32.mrb[32].mxu0 }
0x147d   :  { %v2621_v40 = vpack.c.bf16 %v2615_v39, %v2615_v39  ;;  %v4335_v12 = vpop.f32.mrb[33].mxu0 }
0x147e   :  { %v2618_v31 = vpop.f32.mrb[34].mxu0 }
0x147f   :  { %v4336_v52 = vpop.f32.mrb[35].mxu0  ;;  %4149 = vmatmul.mubr.msk.bf16.vlgmr.msra.gmra.mrb[72].mxu1 %vm836_vm1, %v2621_v40 }
0x1480   :  { %2993 = vmatpush1.bf16.msra.mxu1 %v5055_v32  ;;  %3024 = vmatprep.mubr.bf16.mxu1 %v4815_v42 }
0x1481   :  { %2994 = vmatprep.subr.bf16.mxu1 %v5057_v34 }
0x1484   :  { %2995 = vmatpush1.bf16.msra.mxu1 %v5061_v35 }
0x1485   :  { %4364 = vmatprep.subr.bf16.mxu1 %v4811_v50 }
0x151d   :  { %v2799_v18 = vpop.f32.mrb[36].mxu0 }
0x151e   :  { %v2801_v13 = vpop.f32.mrb[37].mxu0 }
0x151f   :  { %v2803_v15 = vpop.f32.mrb[38].mxu0 }
0x1520   :  { %v2804_v17 = vpop.f32.mrb[39].mxu0 }
0x1525   :  { %v2924_v33 = vpop.f32.mrb[30].mxu0 }
0x1526   :  { %v4352_v19 = vpop.f32.mrb[31].mxu0  ;;  %v2928_v20 = vsel %vm913_vm2, %v2924_v33, -inf }
0x1527   :  { %2929 = vmax.xlane.f32.xlu0 %v2928_v20 }
0x153d   :  { %2940 = vrot.lane.b32.xlu0 %v5225_v7, %s4814_s18 }
0x1541   :  { %3035 = vrot.lane.b32.xlu0 %v4937_v55, %s4816_s19 }
0x1552   :  { %v2843_v32 = vpop.f32.mrb[72].mxu1 }
0x1553   :  { %v2844_v34 = vadd.f32 %v2843_v32, %v2799_v18  ;;  %v2845_v35 = vpop.f32.mrb[73].mxu1 }
0x1554   :  { %v2846_v11 = vadd.f32 %v2845_v35, %v2801_v13  ;;  %v2847_v51 = vpop.f32.mrb[74].mxu1 }
0x1555   :  { %v2848_v43 = vpop.f32.mrb[75].mxu1 }
0x15b4   :  { %v2930_v45 = vpop.xlane.xlu0 %2929 }
0x15b5   :  { %v2931_v0 = vsub.f32 %v2924_v33, %v2930_v45 }
0x15b7   :  { %v2932_v1 = vmul.f32 1.442695, %v2931_v0 }
0x15b8   :  { %v2941_v38 = vpop.permute.xlu0 %2940 }
0x15b9   :  { %4661 = vpow2.f32 %v2932_v1  ;;  %v2946_v41 = vsel %vm930_vm3, %v2941_v38, 0 }
0x15ba   :  { %4354 = vmatpush3.bf16.msra.mxu0 %v2946_v41 }
0x15bb   :  { %4359 = vmatprep.subr.mxu0 %v4811_v50 }
0x15bc   :  { %v3036_v59 = vpop.permute.xlu0 %3035 }
0x15c3   :  { %v4662_v61 = vpop.eup %4661 }
0x15c4   :  { %v2934_v2 = vsel %vm913_vm2, %v4662_v61, 0.0 }
0x15c5   :  { %2935 = vadd.xlane.f32.xlu1 %v2934_v2 }
0x15d6   :  { %3037 = vrot.lane.b32.xlu1 %v4939_v56, %s4816_s19 }
0x1652   :  { %v2936_v55 = vpop.xlane.xlu1 %2935 }
0x1653   :  { %4663 = vrcp.f32 %v2936_v55 }
0x1656   :  { %v3038_v47 = vpop.permute.xlu1 %3037 }
0x165d   :  { %v4664_v30 = vpop.eup %4663 }
0x165e   :  { %v2938_v4 = vmul.f32 %v4664_v30, %v4662_v61 }
0x1660   :  { %v2939_v44 = vpack.c.bf16 %v2938_v4, %v2938_v4 }
0x1662   :  { %4356 = vmatmul.mubr.msk.bf16.vlgmr.msra.gmra.mrb[40].mxu0 %vm913_vm2, %v2939_v44 }
0x1663   :  { %4360 = vmatpush3.xpose.msk.msra.mxu0 %vm836_vm1, %v3038_v47  ;;  %4361 = vmatprep.mubr.msk.f32.mxu0 %vm4812_vm0, %v4811_v50 }
0x1664   :  { %3177 = vmatprep.subr.bf16.mxu0 %v5100_v46 }
0x166a   :  { %4362 = vmatmul.mubr.msk.f32.vlgmr.msra.gmra.mrb[44].mxu0 %vm836_vm1, %v3036_v59 }
0x166b   :  { %3178 = vmatpush1.bf16.msra.mxu0 %v5102_v48  ;;  %3209 = vmatprep.mubr.bf16.mxu0 %v4815_v42 }
0x166c   :  { %3179 = vmatprep.subr.bf16.mxu0 %v5108_v60 }
0x166f   :  { %3180 = vmatpush1.bf16.msra.mxu0 %v5106_v49 }
0x1670   :  { %3359 = vmatprep.subr.bf16.mxu0 %v5116_v63 }
0x1735   :  { %v2982_v56 = vpop.f32.mrb[40].mxu0 }
0x1736   :  { %v2988_v29 = vpack.c.bf16 %v2982_v56, %v2982_v56  ;;  %v4357_v6 = vpop.f32.mrb[41].mxu0 }
0x1737   :  { %v2985_v16 = vpop.f32.mrb[42].mxu0 }
0x1738   :  { %v4358_v37 = vpop.f32.mrb[43].mxu0  ;;  %4153 = vmatmul.mubr.msk.bf16.vlgmr.msra.gmra.mrb[76].mxu1 %vm836_vm1, %v2988_v29 }
0x1739   :  { %4366 = vmatprep.mubr.msk.bf16.mxu1 %vm4812_vm0, %v4811_v50 }
0x173d   :  { %v3109_v46 = vpop.f32.mrb[44].mxu0 }
0x173e   :  { %v4363_v48 = vpop.f32.mrb[45].mxu0  ;;  %v3113_v39 = vsel %vm913_vm2, %v3109_v46, -inf }
0x173f   :  { %3114 = vmax.xlane.f32.xlu0 %v3113_v39 }
0x1755   :  { %3125 = vrot.lane.b32.xlu0 %v5225_v7, %s4816_s19 }
0x1759   :  { %3404 = vrot.lane.b32.xlu0 %v4946_v58, %s4813_s3 }
0x17cc   :  { %v3115_v49 = vpop.xlane.xlu0 %3114 }
0x17cd   :  { %v3116_v60 = vsub.f32 %v3109_v46, %v3115_v49 }
0x17cf   :  { %v3117_v63 = vmul.f32 1.442695, %v3116_v60 }
0x17d0   :  { %v3126_v40 = vpop.permute.xlu0 %3125 }
0x17d1   :  { %4665 = vpow2.f32 %v3117_v63  ;;  %v3131_v12 = vsel %vm930_vm3, %v3126_v40, 0 }
0x17d2   :  { %4365 = vmatpush3.bf16.msra.mxu1 %v3131_v12 }
0x17d3   :  { %4370 = vmatprep.subr.mxu1 %v4811_v50 }
0x17d4   :  { %v3405_v37 = vpop.permute.xlu0 %3404 }
0x17db   :  { %v4666_v31 = vpop.eup %4665 }
0x17dc   :  { %v3119_v52 = vsel %vm913_vm2, %v4666_v31, 0.0 }
0x17dd   :  { %3120 = vadd.xlane.f32.xlu1 %v3119_v52 }
0x180b   :  { %v3026_v18 = vpop.f32.mrb[76].mxu1 }
0x180c   :  { %v3033_v13 = vadd.f32 %v3026_v18, %v2844_v34  ;;  %v3028_v7 = vpop.f32.mrb[77].mxu1  ;;  %v5329_v34 = vpack.c.bf16 %v4961_v62, %v4961_v62 }
0x180d   :  { %v3034_v15 = vadd.f32 %v3028_v7, %v2846_v11  ;;  %v3030_v17 = vpop.f32.mrb[78].mxu1 }
0x180e   :  { %v3031_v33 = vpop.f32.mrb[79].mxu1  ;;  %v3313_v11 = vsel %vm930_vm3, %v5329_v34, 0 }
0x186a   :  { %v3121_v19 = vpop.xlane.xlu1 %3120 }
0x186b   :  { %4667 = vrcp.f32 %v3121_v19 }
0x1875   :  { %v4668_v20 = vpop.eup %4667 }
0x1876   :  { %v3123_v32 = vmul.f32 %v4668_v20, %v4666_v31 }
0x1878   :  { %v3124_v35 = vpack.c.bf16 %v3123_v32, %v3123_v32 }
0x187a   :  { %4367 = vmatmul.mubr.msk.bf16.vlgmr.msra.gmra.mrb[80].mxu1 %vm913_vm2, %v3124_v35 }
0x187b   :  { %4371 = vmatpush3.xpose.msk.msra.mxu1 %vm836_vm1, %v4946_v58  ;;  %4372 = vmatprep.mubr.msk.f32.mxu1 %vm4812_vm0, %v4811_v50 }
0x187c   :  { %4375 = vmatprep.subr.bf16.mxu1 %v4811_v50 }
0x1882   :  { %4373 = vmatmul.mubr.msk.f32.vlgmr.msra.gmra.mrb[66].mxu1 %vm836_vm1, %v4944_v57 }
0x1883   :  { %4376 = vmatpush3.bf16.msra.mxu1 %v3313_v11  ;;  %4377 = vmatprep.mubr.msk.bf16.mxu1 %vm4812_vm0, %v4811_v50 }
0x1884   :  { %4381 = vmatprep.subr.mxu1 %v4811_v50 }
0x194d   :  { %v3167_v51 = vpop.f32.mrb[80].mxu1 }
0x194e   :  { %v3173_v43 = vpack.c.bf16 %v3167_v51, %v3167_v51  ;;  %v4368_v45 = vpop.f32.mrb[81].mxu1 }
0x194f   :  { %v3170_v0 = vpop.f32.mrb[82].mxu1 }
0x1950   :  { %v4369_v1 = vpop.f32.mrb[83].mxu1  ;;  %4157 = vmatmul.mubr.msk.bf16.vlgmr.msra.gmra.mrb[48].mxu0 %vm836_vm1, %v3173_v43 }
0x1951   :  { %3360 = vmatpush1.bf16.msra.mxu0 %v5119_v3  ;;  %3391 = vmatprep.mubr.bf16.mxu0 %v4815_v42 }
0x1952   :  { %3361 = vmatprep.subr.bf16.mxu0 %v5121_v8 }
0x1955   :  { %v3292_v62 = vpop.f32.mrb[66].mxu1  ;;  %3362 = vmatpush1.bf16.msra.mxu0 %v5125_v14 }
0x1956   :  { %v4374_v38 = vpop.f32.mrb[67].mxu1  ;;  %v3296_v41 = vsel %vm913_vm2, %v3292_v62, -inf  ;;  %4386 = vmatprep.subr.bf16.mxu0 %v4811_v50 }
0x1957   :  { %3297 = vmax.xlane.f32.xlu1 %v3296_v41 }
0x19e4   :  { %v3298_v61 = vpop.xlane.xlu1 %3297 }
0x19e5   :  { %v3299_v2 = vsub.f32 %v3292_v62, %v3298_v61 }
0x19e7   :  { %v3300_v55 = vmul.f32 1.442695, %v3299_v2 }
0x19e9   :  { %4669 = vpow2.f32 %v3300_v55 }
0x19f3   :  { %v4670_v30 = vpop.eup %4669 }
0x19f4   :  { %v3302_v3 = vsel %vm913_vm2, %v4670_v30, 0.0 }
0x19f5   :  { %3303 = vadd.xlane.f32.xlu1 %v3302_v3 }
0x1a06   :  { %3402 = vrot.lane.b32.xlu1 %v4944_v57, %s4813_s3 }
0x1a23   :  { %v3211_v8 = vpop.f32.mrb[48].mxu0 }
0x1a24   :  { %v3218_v4 = vadd.f32 %v3211_v8, %v3033_v13  ;;  %v3213_v14 = vpop.f32.mrb[49].mxu0 }
0x1a25   :  { %v3219_v44 = vadd.f32 %v3213_v14, %v3034_v15  ;;  %v3215_v47 = vpop.f32.mrb[50].mxu0 }
0x1a26   :  { %v3216_v59 = vpop.f32.mrb[51].mxu0 }
0x1a82   :  { %v3304_v56 = vpop.xlane.xlu1 %3303 }
0x1a83   :  { %4671 = vrcp.f32 %v3304_v56 }
0x1a86   :  { %v3403_v46 = vpop.permute.xlu1 %3402 }
0x1a8d   :  { %v4672_v29 = vpop.eup %4671 }
0x1a8e   :  { %v3306_v6 = vmul.f32 %v4672_v29, %v4670_v30 }
0x1a90   :  { %v3307_v16 = vpack.c.bf16 %v3306_v6, %v3306_v6 }
0x1a92   :  { %4378 = vmatmul.mubr.msk.bf16.vlgmr.msra.gmra.mrb[84].mxu1 %vm913_vm2, %v3307_v16 }
0x1a93   :  { %4382 = vmatpush3.xpose.msk.msra.mxu1 %vm836_vm1, %v3405_v37  ;;  %4383 = vmatprep.mubr.msk.f32.mxu1 %vm4812_vm0, %v4811_v50 }
0x1a94   :  { %3545 = vmatprep.subr.bf16.mxu1 %v5146_v24 }
0x1a9a   :  { %4384 = vmatmul.mubr.msk.f32.vlgmr.msra.gmra.mrb[88].mxu1 %vm836_vm1, %v3403_v46 }
0x1a9b   :  { %3546 = vmatpush1.bf16.msra.mxu1 %v5148_v25  ;;  %3577 = vmatprep.mubr.bf16.mxu1 %v4815_v42 }
0x1a9c   :  { %3547 = vmatprep.subr.bf16.mxu1 %v5150_v26 }
0x1a9f   :  { %3548 = vmatpush1.bf16.msra.mxu1 %v5154_v27 }
0x1aa0   :  { %3730 = vmatprep.subr.bf16.mxu1 %v5174_v54 }
0x1b65   :  { %v3349_v48 = vpop.f32.mrb[84].mxu1 }
0x1b66   :  { %v3355_v39 = vpack.c.bf16 %v3349_v48, %v3349_v48  ;;  %v4379_v49 = vpop.f32.mrb[85].mxu1 }
0x1b67   :  { %v3352_v60 = vpop.f32.mrb[86].mxu1 }
0x1b68   :  { %v4380_v63 = vpop.f32.mrb[87].mxu1  ;;  %4161 = vmatmul.mubr.msk.bf16.vlgmr.msra.gmra.mrb[52].mxu0 %vm836_vm1, %v3355_v39 }
0x1b69   :  { %4388 = vmatprep.mubr.msk.bf16.mxu0 %vm4812_vm0, %v4811_v50 }
0x1b6d   :  { %v3476_v24 = vpop.f32.mrb[88].mxu1 }
0x1b6e   :  { %v4385_v25 = vpop.f32.mrb[89].mxu1  ;;  %v3480_v40 = vsel %vm913_vm2, %v3476_v24, -inf }
0x1b6f   :  { %3481 = vmax.xlane.f32.xlu0 %v3480_v40 }
0x1b85   :  { %3493 = vrot.lane.b32.xlu0 %v5329_v34, %s4813_s3 }
0x1b89   :  { %3588 = vrot.lane.b32.xlu0 %v4944_v57, %s4814_s18 }
0x1bfc   :  { %v3482_v26 = vpop.xlane.xlu0 %3481 }
0x1bfd   :  { %v3483_v27 = vsub.f32 %v3476_v24, %v3482_v26 }
0x1bff   :  { %v3484_v54 = vmul.f32 1.442695, %v3483_v27 }
0x1c00   :  { %v3494_v12 = vpop.permute.xlu0 %3493 }
0x1c01   :  { %4673 = vpow2.f32 %v3484_v54  ;;  %v3499_v31 = vsel %vm930_vm3, %v3494_v12, 0 }
0x1c02   :  { %4387 = vmatpush3.bf16.msra.mxu0 %v3499_v31 }
0x1c03   :  { %4392 = vmatprep.subr.mxu0 %v4811_v50 }
0x1c04   :  { %v3589_v43 = vpop.permute.xlu0 %3588 }
0x1c0b   :  { %v4674_v52 = vpop.eup %4673 }
0x1c0c   :  { %v3486_v18 = vsel %vm913_vm2, %v4674_v52, 0.0 }
0x1c0d   :  { %3487 = vadd.xlane.f32.xlu1 %v3486_v18 }
0x1c1e   :  { %3590 = vrot.lane.b32.xlu1 %v4946_v58, %s4814_s18 }
0x1c3b   :  { %v3393_v13 = vpop.f32.mrb[52].mxu0 }
0x1c3c   :  { %v3400_v7 = vadd.f32 %v3393_v13, %v3218_v4  ;;  %v3395_v15 = vpop.f32.mrb[53].mxu0 }
0x1c3d   :  { %v3401_v17 = vadd.f32 %v3395_v15, %v3219_v44  ;;  %v3397_v33 = vpop.f32.mrb[54].mxu0 }
0x1c3e   :  { %v3398_v19 = vpop.f32.mrb[55].mxu0 }
0x1c9a   :  { %v3488_v20 = vpop.xlane.xlu1 %3487 }
0x1c9b   :  { %4675 = vrcp.f32 %v3488_v20 }
0x1c9e   :  { %v3591_v51 = vpop.permute.xlu1 %3590 }
0x1ca5   :  { %v4676_v32 = vpop.eup %4675 }
0x1ca6   :  { %v3490_v35 = vmul.f32 %v4676_v32, %v4674_v52 }
0x1ca8   :  { %v3491_v11 = vpack.c.bf16 %v3490_v35, %v3490_v35 }
0x1caa   :  { %4389 = vmatmul.mubr.msk.bf16.vlgmr.msra.gmra.mrb[56].mxu0 %vm913_vm2, %v3491_v11 }
0x1cab   :  { %4393 = vmatpush3.xpose.msk.msra.mxu0 %vm836_vm1, %v3591_v51  ;;  %4394 = vmatprep.mubr.msk.f32.mxu0 %vm4812_vm0, %v4811_v50 }
0x1cac   :  { %4397 = vmatprep.subr.bf16.mxu0 %v4811_v50 }
0x1cb2   :  { %4395 = vmatmul.mubr.msk.f32.vlgmr.msra.gmra.mrb[46].mxu0 %vm836_vm1, %v3589_v43 }
0x1cb3   :  { %4399 = vmatprep.mubr.msk.bf16.mxu0 %vm4812_vm0, %v4811_v50 }
0x1d7d   :  { %v3535_v45 = vpop.f32.mrb[56].mxu0 }
0x1d7e   :  { %v3541_v0 = vpack.c.bf16 %v3535_v45, %v3535_v45  ;;  %v4390_v1 = vpop.f32.mrb[57].mxu0 }
0x1d7f   :  { %v3538_v62 = vpop.f32.mrb[58].mxu0 }
0x1d80   :  { %v4391_v38 = vpop.f32.mrb[59].mxu0  ;;  %4165 = vmatmul.mubr.msk.bf16.vlgmr.msra.gmra.mrb[92].mxu1 %vm836_vm1, %v3541_v0 }
0x1d81   :  { %3731 = vmatpush1.bf16.msra.mxu1 %v5172_v23  ;;  %3762 = vmatprep.mubr.bf16.mxu1 %v4815_v42 }
0x1d82   :  { %3732 = vmatprep.subr.bf16.mxu1 %v5176_v5 }
0x1d85   :  { %v3662_v41 = vpop.f32.mrb[46].mxu0  ;;  %3733 = vmatpush1.bf16.msra.mxu1 %v5180_v53 }
0x1d86   :  { %v4396_v61 = vpop.f32.mrb[47].mxu0  ;;  %v3666_v2 = vsel %vm913_vm2, %v3662_v41, -inf  ;;  %4408 = vmatprep.subr.bf16.mxu1 %v4811_v50 }
0x1d87   :  { %3667 = vmax.xlane.f32.xlu0 %v3666_v2 }
0x1d9d   :  { %3678 = vrot.lane.b32.xlu0 %v5329_v34, %s4814_s18 }
0x1da1   :  { %3773 = vrot.lane.b32.xlu0 %v4944_v57, %s4816_s19 }
0x1e14   :  { %v3668_v23 = vpop.xlane.xlu0 %3667 }
0x1e15   :  { %v3669_v55 = vsub.f32 %v3662_v41, %v3668_v23 }
0x1e17   :  { %v3670_v30 = vmul.f32 1.442695, %v3669_v55 }
0x1e18   :  { %v3679_v3 = vpop.permute.xlu0 %3678 }
0x1e19   :  { %4677 = vpow2.f32 %v3670_v30  ;;  %v3684_v5 = vsel %vm930_vm3, %v3679_v3, 0 }
0x1e1a   :  { %4398 = vmatpush3.bf16.msra.mxu0 %v3684_v5 }
0x1e1b   :  { %4403 = vmatprep.subr.mxu0 %v4811_v50 }
0x1e23   :  { %v4678_v53 = vpop.eup %4677 }
0x1e24   :  { %v3672_v8 = vsel %vm913_vm2, %v4678_v53, 0.0 }
0x1e25   :  { %3673 = vadd.xlane.f32.xlu1 %v3672_v8 }
0x1e36   :  { %3775 = vrot.lane.b32.xlu1 %v4946_v58, %s4816_s19  ;;  %v3774_v58 = vpop.permute.xlu0 %3773 }
0x1e53   :  { %v3579_v4 = vpop.f32.mrb[92].mxu1 }
0x1e54   :  { %v3586_v14 = vadd.f32 %v3579_v4, %v3400_v7  ;;  %v3581_v57 = vpop.f32.mrb[93].mxu1 }
0x1e55   :  { %v3587_v44 = vadd.f32 %v3581_v57, %v3401_v17  ;;  %v3583_v47 = vpop.f32.mrb[94].mxu1 }
0x1e56   :  { %v3584_v59 = vpop.f32.mrb[95].mxu1 }
0x1eb2   :  { %v3674_v56 = vpop.xlane.xlu1 %3673 }
0x1eb3   :  { %4679 = vrcp.f32 %v3674_v56 }
0x1eb6   :  { %v3776_v37 = vpop.permute.xlu1 %3775 }
0x1ebd   :  { %v4680_v29 = vpop.eup %4679 }
0x1ebe   :  { %v3676_v6 = vmul.f32 %v4680_v29, %v4678_v53 }
0x1ec0   :  { %v3677_v16 = vpack.c.bf16 %v3676_v6, %v3676_v6 }
0x1ec2   :  { %4400 = vmatmul.mubr.msk.bf16.vlgmr.msra.gmra.mrb[60].mxu0 %vm913_vm2, %v3677_v16 }
0x1ec3   :  { %4404 = vmatpush3.xpose.msk.msra.mxu0 %vm836_vm1, %v3776_v37  ;;  %4405 = vmatprep.mubr.msk.f32.mxu0 %vm4812_vm0, %v4811_v50 }
0x1ec4   :  { %3915 = vmatprep.subr.bf16.mxu0 %v5204_v22 }
0x1eca   :  { %4406 = vmatmul.mubr.msk.f32.vlgmr.msra.gmra.mrb[64].mxu0 %vm836_vm1, %v3774_v58 }
0x1ecb   :  { %3916 = vmatpush1.bf16.msra.mxu0 %v5202_v21  ;;  %3947 = vmatprep.mubr.bf16.mxu0 %v4815_v42 }
0x1ecc   :  { %3917 = vmatprep.subr.bf16.mxu0 %v5206_v28 }
0x1ecf   :  { %3918 = vmatpush1.bf16.msra.mxu0 %v5210_v10 }
0x1f95   :  { %v3720_v46 = vpop.f32.mrb[60].mxu0 }
0x1f96   :  { %v3726_v48 = vpack.c.bf16 %v3720_v46, %v3720_v46  ;;  %v4401_v39 = vpop.f32.mrb[61].mxu0 }
0x1f97   :  { %v3723_v49 = vpop.f32.mrb[62].mxu0 }
0x1f98   :  { %v4402_v60 = vpop.f32.mrb[63].mxu0  ;;  %4169 = vmatmul.mubr.msk.bf16.vlgmr.msra.gmra.mrb[96].mxu1 %vm836_vm1, %v3726_v48 }
0x1f99   :  { %4410 = vmatprep.mubr.msk.bf16.mxu1 %vm4812_vm0, %v4811_v50 }
0x1f9d   :  { %v3847_v22 = vpop.f32.mrb[64].mxu0 }
0x1f9e   :  { %v4407_v63 = vpop.f32.mrb[65].mxu0  ;;  %v3851_v21 = vsel %vm913_vm2, %v3847_v22, -inf }
0x1f9f   :  { %3852 = vmax.xlane.f32.xlu0 %v3851_v21 }
0x1fb5   :  { %3863 = vrot.lane.b32.xlu0 %v5329_v34, %s4816_s19 }
0x202c   :  { %v3853_v42 = vpop.xlane.xlu0 %3852 }
0x202d   :  { %v3854_v28 = vsub.f32 %v3847_v22, %v3853_v42 }
0x202f   :  { %v3855_v10 = vmul.f32 1.442695, %v3854_v28 }
0x2030   :  { %v3864_v24 = vpop.permute.xlu0 %3863 }
0x2031   :  { %4681 = vpow2.f32 %v3855_v10  ;;  %v3869_v25 = vsel %vm930_vm3, %v3864_v24, 0 }
0x2032   :  { %4409 = vmatpush3.bf16.msra.mxu1 %v3869_v25 }
0x203b   :  { %v4682_v40 = vpop.eup %4681 }
0x203c   :  { %v3857_v26 = vsel %vm913_vm2, %v4682_v40, 0.0 }
0x203d   :  { %3858 = vadd.xlane.f32.xlu1 %v3857_v26 }
0x206b   :  { %v3764_v50 = vpop.f32.mrb[96].mxu1 }
0x206c   :  { %v3771_v27 = vadd.f32 %v3764_v50, %v3586_v14  ;;  %v3766_v54 = vpop.f32.mrb[97].mxu1 }
0x206d   :  { %v3772_v12 = vadd.f32 %v3766_v54, %v3587_v44  ;;  %v3768_v31 = vpop.f32.mrb[98].mxu1 }
0x206e   :  { %v3769_v52 = vpop.f32.mrb[99].mxu1 }
0x20ca   :  { %v3859_v18 = vpop.xlane.xlu1 %3858 }
0x20cb   :  { %4683 = vrcp.f32 %v3859_v18 }
0x20d5   :  { %v4684_v34 = vpop.eup %4683 }
0x20d6   :  { %v3861_v13 = vmul.f32 %v4684_v34, %v4682_v40 }
0x20d8   :  { %v3862_v7 = vpack.c.bf16 %v3861_v13, %v3861_v13 }
0x20da   :  { %4411 = vmatmul.mubr.msk.bf16.vlgmr.msra.gmra.mrb[100].mxu1 %vm913_vm2, %v3862_v7 }
0x21ad   :  { %v3905_v15 = vpop.f32.mrb[100].mxu1 }
0x21ae   :  { %v3911_v17 = vpack.c.bf16 %v3905_v15, %v3905_v15  ;;  %v4412_v33 = vpop.f32.mrb[101].mxu1 }
0x21af   :  { %v3908_v19 = vpop.f32.mrb[102].mxu1 }
0x21b0   :  { %v4413_v20 = vpop.f32.mrb[103].mxu1  ;;  %4173 = vmatmul.mubr.msk.bf16.vlgmr.msra.gmra.mrb[68].mxu0 %vm836_vm1, %v3911_v17 }
0x2283   :  { %v3949_v32 = vpop.f32.mrb[68].mxu0 }
0x2284   :  { %v3956_v35 = vadd.f32 %v3949_v32, %v3771_v27  ;;  %v3951_v11 = vpop.f32.mrb[69].mxu0 }
0x2285   :  { %v3957_v51 = vadd.f32 %v3951_v11, %v3772_v12  ;;  %v3953_v43 = vpop.f32.mrb[70].mxu0 }
0x2286   :  { %v3958_v45 = vadd.f32 %v3956_v35, %v5245_v36  ;;  %v3954_v0 = vpop.f32.mrb[71].mxu0 }
0x2287   :  { %v3959_v1 = vadd.f32 %v3957_v51, %v5247_v9 }
0x2288   :  { %3961 = vst [vmem:[#allocation10 + $0x10] sm:$0xff] %v3958_v45 }
0x2289   :  { %3962 = vst [vmem:[#allocation10 + $0x18] sm:$0xff] %v3959_v1 }
0x228a   :  { %4784 = shalt.err (!%p4781_p8)
}
0x228b   :  { %s4785_s27 = scalar_lea.hbm %s5438_s5, 512 }
0x228c   :  { %p4786_p9 = scmp.ne.s32.totalorder %s5438_s5, %s4785_s27  ;;  %p4789_p10 = scmp.lt.u32.totalorder %s4785_s27, %s5438_s5 }
0x228e   :  { %p4791_p11 = pnand %p4789_p10, %p4786_p9 }
0x2290   :  { %4794 = shalt.err (!%p4791_p11)
}
0x2291   :  { %3974 = dma.vmem_to_hbm [thread:$0]  %s3969_s23, 512, %s5438_s5, [#allocation4], %s4805_s30, %s4805_s30, %s4806_s6  }
0x2292   :  { %4801 = dma.done.wait [#allocation4], 512  }
0x2293   :  { %4802 = vsyncadd [#allocation4], 4294966784 }
0x2294   :  { %3978 = vsyncpa [#allocation3], 1 }
0x2295   :  { %3979 = vsyncpa [#allocation6], 1 }
0x2296   :  { %3980 = vsyncpa [#allocation9], 1 }
0x2297   :  { %3981 = vsyncpa [#allocation4], 1 }

</bundles_post_ra>
